<compile_context>
chip_gen: v7x
topology: tpu7x:2x2x1
jax: 0.10.0
libtpu: 0.0.40
codegen_flags: <defaults>
</compile_context>

<pallas_src>
import functools

import jax
import jax.numpy as jnp
from jax.experimental import pallas as pl
from jax.experimental.pallas import tpu as pltpu


def _prenorm2_xattn_kernel(x_ref, m_ref, g_ref, b_ref, wq_ref, wkv_ref, wo_ref,
                           bo_ref, o_ref, *, heads, dim_head, use_softmax, eps):
    bt, n, dim = x_ref.shape
    _, nm, _ = m_ref.shape
    inner = heads * dim_head

    gamma = g_ref[...].astype(jnp.float32)        # (1, dim)
    beta = b_ref[...].astype(jnp.float32)         # (1, dim)

    def layer_norm(rows):                         # (R, dim) f32 -> (R, dim) f32
        mu = jnp.mean(rows, axis=-1, keepdims=True)
        xc = rows - mu
        var = jnp.mean(xc * xc, axis=-1, keepdims=True)
        return xc * jax.lax.rsqrt(var + eps) * gamma + beta

    # Shared LayerNorm (PreNorm2 semantics) applied to both inputs, in f32.
    x2d = x_ref[...].reshape(bt * n, dim).astype(jnp.float32)
    m2d = m_ref[...].reshape(bt * nm, dim).astype(jnp.float32)
    xn = layer_norm(x2d).astype(wq_ref.dtype)     # -> bf16 for the MXU
    mn = layer_norm(m2d).astype(wkv_ref.dtype)

    # Fused projections: Q (scale already folded into Wq) and [K|V] together.
    q = jnp.dot(xn, wq_ref[...], preferred_element_type=jnp.float32)    # (bt*n, inner)
    kv = jnp.dot(mn, wkv_ref[...], preferred_element_type=jnp.float32)  # (bt*nm, 2*inner)

    qb = q.reshape(bt, n, inner).astype(jnp.bfloat16)
    kv = kv.reshape(bt, nm, 2 * inner)
    k = kv[:, :, :inner].astype(jnp.bfloat16)     # (bt, nm, inner)
    v = kv[:, :, inner:].astype(jnp.bfloat16)     # (bt, nm, inner)

    # Single hoisted key transpose (one XLU transpose per batch tile, not per head).
    kT = jnp.swapaxes(k, -1, -2)                  # (bt, inner, nm)

    wo = wo_ref[...]                              # (inner, dim) bf16
    acc = jnp.zeros((bt * n, dim), jnp.float32)

    # TODO(synk): the optional boolean `mask` path of the wrapped Cross_Attention
    # (F.pad + outer-product masking) is not implemented; this is mask=None.
    for h in range(heads):
        lo = h * dim_head
        hi = lo + dim_head
        qh = qb[:, :, lo:hi]                      # (bt, n, d)
        kTh = kT[:, lo:hi, :]                     # (bt, d, nm)   sublane slice
        vh = v[:, :, lo:hi]                       # (bt, nm, d)

        dots = jnp.einsum('bnd,bdm->bnm', qh, kTh,
                          preferred_element_type=jnp.float32)   # (bt, n, nm)
        if use_softmax:
            dots = dots - jnp.max(dots, axis=-1, keepdims=True)
            e = jnp.exp(dots)
            attn = e * pl.reciprocal(jnp.sum(e, axis=-1, keepdims=True),
                                     approx=True)
        else:
            attn = dots

        oh = jnp.einsum('bnm,bmd->bnd', attn.astype(jnp.bfloat16), vh,
                        preferred_element_type=jnp.float32)     # (bt, n, d)

        # Accumulate the output projection per head (no lane-axis concat):
        #   out += oh @ Wo[lo:hi, :]    (sublane slice of Wo)
        acc = acc + jnp.dot(oh.reshape(bt * n, dim_head).astype(jnp.bfloat16),
                            wo[lo:hi, :], preferred_element_type=jnp.float32)

    out = acc + bo_ref[...].astype(jnp.float32)   # (1, dim) broadcasts over rows
    o_ref[...] = out.reshape(bt, n, dim).astype(o_ref.dtype)


def _pick_b_tile(b):
    # Amortize per-grid-step overhead, but keep >=2 'parallel' steps when
    # possible so v7x's two TensorCores both get work.
    if b <= 1:
        return 1
    target = min(16, max(1, b // 2))
    for bt in range(target, 0, -1):
        if b % bt == 0:
            return bt
    return 1


def prenorm2_cross_attention(x, m, params, *, heads=8, dim_head=8, softmax=True,
                             eps=1e-5, b_tile=None):
    """x: (b, n, dim), x2=m: (b, nm, dim). Returns (b, n, dim) float32."""
    b, n, dim = x.shape
    _, nm, _ = m.shape
    inner = heads * dim_head
    scale = float(dim) ** -0.5
    gamma, beta, wq, wk, wv, wo, bo = params

    # Boundary-side constant folds: bf16 operands (half the DMA bytes),
    # scale folded into Wq, K|V weights fused into one matrix.
    cdt = jnp.bfloat16
    x_b = x.astype(cdt)
    m_b = m.astype(cdt)
    g_b = jnp.asarray(gamma, jnp.float32).reshape(1, dim).astype(cdt)
    be_b = jnp.asarray(beta, jnp.float32).reshape(1, dim).astype(cdt)
    wq_b = (jnp.asarray(wq, jnp.float32) * scale).astype(cdt)       # (dim, inner)
    wkv_b = jnp.concatenate([jnp.asarray(wk, jnp.float32),
                             jnp.asarray(wv, jnp.float32)], axis=-1).astype(cdt)
    wo_b = jnp.asarray(wo, jnp.float32).astype(cdt)                 # (inner, dim)
    bo_b = jnp.asarray(bo, jnp.float32).reshape(1, dim)             # keep f32 add

    bt = _pick_b_tile(b) if b_tile is None else b_tile
    assert b % bt == 0, "batch must be divisible by the batch tile"
    nb = b // bt

    kernel = functools.partial(
        _prenorm2_xattn_kernel,
        heads=heads, dim_head=dim_head, use_softmax=softmax, eps=eps,
    )

    return pl.pallas_call(
        kernel,
        out_shape=jax.ShapeDtypeStruct((b, n, dim), jnp.float32),
        grid_spec=pltpu.PrefetchScalarGridSpec(
            num_scalar_prefetch=0,
            grid=(nb,),
            in_specs=[
                pl.BlockSpec((bt, n, dim), lambda i: (i, 0, 0)),
                pl.BlockSpec((bt, nm, dim), lambda i: (i, 0, 0)),
                pl.BlockSpec((1, dim), lambda i: (0, 0)),
                pl.BlockSpec((1, dim), lambda i: (0, 0)),
                pl.BlockSpec((dim, inner), lambda i: (0, 0)),
                pl.BlockSpec((dim, 2 * inner), lambda i: (0, 0)),
                pl.BlockSpec((inner, dim), lambda i: (0, 0)),
                pl.BlockSpec((1, dim), lambda i: (0, 0)),
            ],
            out_specs=pl.BlockSpec((bt, n, dim), lambda i: (i, 0, 0)),
        ),
        compiler_params=pltpu.CompilerParams(
            dimension_semantics=("parallel",),
        ),
    )(x_b, m_b, g_b, be_b, wq_b, wkv_b, wo_b, bo_b)


def prenorm2_cross_attention_ref(x, m, params, *, heads=8, dim_head=8,
                                 softmax=True, eps=1e-5):
    """Pure-JAX f32 reference matching PreNorm2(dim, Cross_Attention) forward."""
    x = jnp.asarray(x, jnp.float32)
    m = jnp.asarray(m, jnp.float32)
    gamma, beta, wq, wk, wv, wo, bo = [jnp.asarray(p, jnp.float32) for p in params]

    def ln(t):
        mu = jnp.mean(t, axis=-1, keepdims=True)
        var = jnp.mean((t - mu) ** 2, axis=-1, keepdims=True)
        return (t - mu) * jax.lax.rsqrt(var + eps) * gamma + beta

    xn, mn = ln(x), ln(m)
    b, n, dim = x.shape
    scale = float(dim) ** -0.5

    def split_heads(t):  # (b, s, h*d) -> (b, h, s, d)
        return t.reshape(b, t.shape[1], heads, dim_head).transpose(0, 2, 1, 3)

    q = split_heads(xn @ wq)
    k = split_heads(mn @ wk)
    v = split_heads(mn @ wv)
    dots = jnp.einsum('bhid,bhjd->bhij', q, k) * scale
    attn = jax.nn.softmax(dots, axis=-1) if softmax else dots
    out = jnp.einsum('bhij,bhjd->bhid', attn, v)
    out = out.transpose(0, 2, 1, 3).reshape(b, n, heads * dim_head)
    return out @ wo + bo


def init_params(key, dim, heads=8, dim_head=8):
    inner = heads * dim_head
    ks = jax.random.split(key, 7)
    bq = 1.0 / (dim ** 0.5)
    bo_bound = 1.0 / (inner ** 0.5)
    gamma = 1.0 + 0.1 * jax.random.normal(ks[0], (dim,), jnp.float32)
    beta = 0.1 * jax.random.normal(ks[1], (dim,), jnp.float32)
    wq = jax.random.uniform(ks[2], (dim, inner), jnp.float32, -bq, bq)
    wk = jax.random.uniform(ks[3], (dim, inner), jnp.float32, -bq, bq)
    wv = jax.random.uniform(ks[4], (dim, inner), jnp.float32, -bq, bq)
    wo = jax.random.uniform(ks[5], (inner, dim), jnp.float32, -bo_bound, bo_bound)
    bo = jax.random.uniform(ks[6], (dim,), jnp.float32, -bo_bound, bo_bound)
    return gamma, beta, wq, wk, wv, wo, bo


if __name__ == "__main__":
    # Small shapes: batch=2, seq(query)=8, seq(memory)=8, dim=32, heads=8, dim_head=8.
    B, N, NM, DIM = 2, 8, 8, 32
    HEADS, DIM_HEAD = 8, 8

    key = jax.random.PRNGKey(0)
    kx, km, kp = jax.random.split(key, 3)
    x = jax.random.normal(kx, (B, N, DIM), jnp.float32)
    m = jax.random.normal(km, (B, NM, DIM), jnp.float32)
    params = init_params(kp, DIM, HEADS, DIM_HEAD)

    # Compare on the same bf16-rounded operands the kernel consumes, so the only
    # difference left is in-kernel bf16 matmul rounding (f32 accumulation).
    rnd = lambda a: a.astype(jnp.bfloat16).astype(jnp.float32)
    x_r, m_r = rnd(x), rnd(m)
    params_r = tuple(rnd(p) for p in params)

    out = prenorm2_cross_attention(x_r, m_r, params_r,
                                   heads=HEADS, dim_head=DIM_HEAD, softmax=True)
    out = jax.block_until_ready(out)

    ref = prenorm2_cross_attention_ref(x_r, m_r, params_r,
                                       heads=HEADS, dim_head=DIM_HEAD, softmax=True)
    assert out.shape == (B, N, DIM)
    max_err = float(jnp.max(jnp.abs(out - ref)))
    assert jnp.allclose(out, ref, atol=2e-2, rtol=2e-2), \
        f"Pallas kernel mismatch vs reference (max abs err={max_err})"

    print("KERNEL_OK")
</pallas_src>

<mosaic_0001>
module attributes {stable_mosaic.version = 11 : i64} {
  func.func @_prenorm2_xattn_kernel(%arg0: i32, %arg1: memref<1x8x32xbf16, #tpu.memory_space<vmem>>, %arg2: memref<1x8x32xbf16, #tpu.memory_space<vmem>>, %arg3: memref<1x32xbf16, #tpu.memory_space<vmem>>, %arg4: memref<1x32xbf16, #tpu.memory_space<vmem>>, %arg5: memref<32x64xbf16, #tpu.memory_space<vmem>>, %arg6: memref<32x128xbf16, #tpu.memory_space<vmem>>, %arg7: memref<64x32xbf16, #tpu.memory_space<vmem>>, %arg8: memref<1x32xf32, #tpu.memory_space<vmem>>, %arg9: memref<1x8x32xf32, #tpu.memory_space<vmem>>) attributes {dimension_semantics = [#tpu.dimension_semantics<parallel>], iteration_bounds = array<i64: 2>, scalar_prefetch = 0 : i64, scratch_operands = 0 : i64, tpu.core_type = #tpu.core_type<tc>, window_params = [{transform_indices = @transform_0, window_bounds = array<i64: 1, 8, 32>}, {transform_indices = @transform_1, window_bounds = array<i64: 1, 8, 32>}, {pipeline_mode = #tpu.pipeline_mode<synchronous>, transform_indices = @transform_2, window_bounds = array<i64: 1, 32>}, {pipeline_mode = #tpu.pipeline_mode<synchronous>, transform_indices = @transform_3, window_bounds = array<i64: 1, 32>}, {pipeline_mode = #tpu.pipeline_mode<synchronous>, transform_indices = @transform_4, window_bounds = array<i64: 32, 64>}, {pipeline_mode = #tpu.pipeline_mode<synchronous>, transform_indices = @transform_5, window_bounds = array<i64: 32, 128>}, {pipeline_mode = #tpu.pipeline_mode<synchronous>, transform_indices = @transform_6, window_bounds = array<i64: 64, 32>}, {pipeline_mode = #tpu.pipeline_mode<synchronous>, transform_indices = @transform_7, window_bounds = array<i64: 1, 32>}, {transform_indices = @transform_8, window_bounds = array<i64: 1, 8, 32>}]} {
    %c0 = arith.constant 0 : index
    %c0_0 = arith.constant 0 : index
    %0 = vector.load %arg3[%c0, %c0_0] : memref<1x32xbf16, #tpu.memory_space<vmem>>, vector<1x32xbf16>
    %1 = arith.extf %0 : vector<1x32xbf16> to vector<1x32xf32>
    %c0_1 = arith.constant 0 : index
    %c0_2 = arith.constant 0 : index
    %2 = vector.load %arg4[%c0_1, %c0_2] : memref<1x32xbf16, #tpu.memory_space<vmem>>, vector<1x32xbf16>
    %3 = arith.extf %2 : vector<1x32xbf16> to vector<1x32xf32>
    %c0_3 = arith.constant 0 : index
    %c0_4 = arith.constant 0 : index
    %c0_5 = arith.constant 0 : index
    %4 = vector.load %arg1[%c0_3, %c0_4, %c0_5] : memref<1x8x32xbf16, #tpu.memory_space<vmem>>, vector<1x8x32xbf16>
    %5 = vector.shape_cast %4 : vector<1x8x32xbf16> to vector<8x32xbf16>
    %6 = arith.extf %5 : vector<8x32xbf16> to vector<8x32xf32>
    %c0_6 = arith.constant 0 : index
    %c0_7 = arith.constant 0 : index
    %c0_8 = arith.constant 0 : index
    %7 = vector.load %arg2[%c0_6, %c0_7, %c0_8] : memref<1x8x32xbf16, #tpu.memory_space<vmem>>, vector<1x8x32xbf16>
    %8 = vector.shape_cast %7 : vector<1x8x32xbf16> to vector<8x32xbf16>
    %9 = arith.extf %8 : vector<8x32xbf16> to vector<8x32xf32>
    %cst = arith.constant dense<0.000000e+00> : vector<8xf32>
    %10 = vector.multi_reduction <add>, %6, %cst [1] : vector<8x32xf32> to vector<8xf32>
    %11 = vector.shape_cast %10 : vector<8xf32> to vector<8x1xf32>
    %cst_9 = arith.constant 3.200000e+01 : f32
    %12 = vector.broadcast %cst_9 : f32 to vector<8x1xf32>
    %13 = arith.divf %11, %12 : vector<8x1xf32>
    %14 = vector.broadcast %13 : vector<8x1xf32> to vector<8x32xf32>
    %15 = arith.subf %6, %14 : vector<8x32xf32>
    %16 = arith.mulf %15, %15 : vector<8x32xf32>
    %cst_10 = arith.constant dense<0.000000e+00> : vector<8xf32>
    %17 = vector.multi_reduction <add>, %16, %cst_10 [1] : vector<8x32xf32> to vector<8xf32>
    %18 = vector.shape_cast %17 : vector<8xf32> to vector<8x1xf32>
    %cst_11 = arith.constant 3.200000e+01 : f32
    %19 = vector.broadcast %cst_11 : f32 to vector<8x1xf32>
    %20 = arith.divf %18, %19 : vector<8x1xf32>
    %cst_12 = arith.constant 9.99999974E-6 : f32
    %21 = vector.broadcast %cst_12 : f32 to vector<8x1xf32>
    %22 = arith.addf %20, %21 : vector<8x1xf32>
    %23 = math.rsqrt %22 : vector<8x1xf32>
    %24 = vector.broadcast %23 : vector<8x1xf32> to vector<8x32xf32>
    %25 = arith.mulf %15, %24 : vector<8x32xf32>
    %26 = vector.broadcast %1 : vector<1x32xf32> to vector<8x32xf32>
    %27 = arith.mulf %25, %26 : vector<8x32xf32>
    %28 = vector.broadcast %3 : vector<1x32xf32> to vector<8x32xf32>
    %29 = arith.addf %27, %28 : vector<8x32xf32>
    %30 = arith.truncf %29 : vector<8x32xf32> to vector<8x32xbf16>
    %cst_13 = arith.constant dense<0.000000e+00> : vector<8xf32>
    %31 = vector.multi_reduction <add>, %9, %cst_13 [1] : vector<8x32xf32> to vector<8xf32>
    %32 = vector.shape_cast %31 : vector<8xf32> to vector<8x1xf32>
    %cst_14 = arith.constant 3.200000e+01 : f32
    %33 = vector.broadcast %cst_14 : f32 to vector<8x1xf32>
    %34 = arith.divf %32, %33 : vector<8x1xf32>
    %35 = vector.broadcast %34 : vector<8x1xf32> to vector<8x32xf32>
    %36 = arith.subf %9, %35 : vector<8x32xf32>
    %37 = arith.mulf %36, %36 : vector<8x32xf32>
    %cst_15 = arith.constant dense<0.000000e+00> : vector<8xf32>
    %38 = vector.multi_reduction <add>, %37, %cst_15 [1] : vector<8x32xf32> to vector<8xf32>
    %39 = vector.shape_cast %38 : vector<8xf32> to vector<8x1xf32>
    %cst_16 = arith.constant 3.200000e+01 : f32
    %40 = vector.broadcast %cst_16 : f32 to vector<8x1xf32>
    %41 = arith.divf %39, %40 : vector<8x1xf32>
    %cst_17 = arith.constant 9.99999974E-6 : f32
    %42 = vector.broadcast %cst_17 : f32 to vector<8x1xf32>
    %43 = arith.addf %41, %42 : vector<8x1xf32>
    %44 = math.rsqrt %43 : vector<8x1xf32>
    %45 = vector.broadcast %44 : vector<8x1xf32> to vector<8x32xf32>
    %46 = arith.mulf %36, %45 : vector<8x32xf32>
    %47 = vector.broadcast %1 : vector<1x32xf32> to vector<8x32xf32>
    %48 = arith.mulf %46, %47 : vector<8x32xf32>
    %49 = vector.broadcast %3 : vector<1x32xf32> to vector<8x32xf32>
    %50 = arith.addf %48, %49 : vector<8x32xf32>
    %51 = arith.truncf %50 : vector<8x32xf32> to vector<8x32xbf16>
    %c0_18 = arith.constant 0 : index
    %c0_19 = arith.constant 0 : index
    %52 = vector.load %arg5[%c0_18, %c0_19] : memref<32x64xbf16, #tpu.memory_space<vmem>>, vector<32x64xbf16>
    %cst_20 = arith.constant dense<0.000000e+00> : vector<8x64xf32>
    %53 = tpu.matmul %30, %52, %cst_20 {dimension_numbers = #tpu.dot_dimension_numbers<[1], [0], [0], [1], [0, 0, 1, 1], [], []>} : vector<8x32xbf16>, vector<32x64xbf16>, vector<8x64xf32> -> vector<8x64xf32>
    %c0_21 = arith.constant 0 : index
    %c0_22 = arith.constant 0 : index
    %54 = vector.load %arg6[%c0_21, %c0_22] : memref<32x128xbf16, #tpu.memory_space<vmem>>, vector<32x128xbf16>
    %cst_23 = arith.constant dense<0.000000e+00> : vector<8x128xf32>
    %55 = tpu.matmul %51, %54, %cst_23 {dimension_numbers = #tpu.dot_dimension_numbers<[1], [0], [0], [1], [0, 0, 1, 1], [], []>} : vector<8x32xbf16>, vector<32x128xbf16>, vector<8x128xf32> -> vector<8x128xf32>
    %56 = vector.shape_cast %53 : vector<8x64xf32> to vector<1x8x64xf32>
    %57 = arith.truncf %56 : vector<1x8x64xf32> to vector<1x8x64xbf16>
    %58 = vector.shape_cast %55 : vector<8x128xf32> to vector<1x8x128xf32>
    %59 = vector.extract_strided_slice %58 {offsets = [0, 0, 0], sizes = [1, 8, 64], strides = [1, 1, 1]} : vector<1x8x128xf32> to vector<1x8x64xf32>
    %60 = arith.truncf %59 : vector<1x8x64xf32> to vector<1x8x64xbf16>
    %61 = vector.extract_strided_slice %58 {offsets = [0, 0, 64], sizes = [1, 8, 64], strides = [1, 1, 1]} : vector<1x8x128xf32> to vector<1x8x64xf32>
    %62 = arith.truncf %61 : vector<1x8x64xf32> to vector<1x8x64xbf16>
    %63 = tpu.transpose %60, [0, 2, 1] : vector<1x8x64xbf16> -> vector<1x64x8xbf16>
    %c0_24 = arith.constant 0 : index
    %c0_25 = arith.constant 0 : index
    %64 = vector.load %arg7[%c0_24, %c0_25] : memref<64x32xbf16, #tpu.memory_space<vmem>>, vector<64x32xbf16>
    %cst_26 = arith.constant 0.000000e+00 : f32
    %65 = vector.broadcast %cst_26 : f32 to vector<8x32xf32>
    %66 = vector.extract_strided_slice %57 {offsets = [0, 0, 0], sizes = [1, 8, 8], strides = [1, 1, 1]} : vector<1x8x64xbf16> to vector<1x8x8xbf16>
    %67 = vector.extract_strided_slice %63 {offsets = [0, 0, 0], sizes = [1, 8, 8], strides = [1, 1, 1]} : vector<1x64x8xbf16> to vector<1x8x8xbf16>
    %68 = vector.extract_strided_slice %62 {offsets = [0, 0, 0], sizes = [1, 8, 8], strides = [1, 1, 1]} : vector<1x8x64xbf16> to vector<1x8x8xbf16>
    "tpu.trace_start"() <{level = 10 : i32, message = "bnd,bdm->bnm"}> : () -> ()
    %cst_27 = arith.constant dense<0.000000e+00> : vector<1x8x8xf32>
    %69 = tpu.matmul %66, %67, %cst_27 {dimension_numbers = #tpu.dot_dimension_numbers<[2], [1], [1], [2], [0, 0, 0, 1, 1, 2], [0], [0]>} : vector<1x8x8xbf16>, vector<1x8x8xbf16>, vector<1x8x8xf32> -> vector<1x8x8xf32>
    "tpu.trace_stop"() : () -> ()
    %cst_28 = arith.constant dense<0xFF800000> : vector<1x8xf32>
    %70 = vector.multi_reduction <maximumf>, %69, %cst_28 [2] : vector<1x8x8xf32> to vector<1x8xf32>
    %71 = vector.shape_cast %70 : vector<1x8xf32> to vector<1x8x1xf32>
    %72 = vector.broadcast %71 : vector<1x8x1xf32> to vector<1x8x8xf32>
    %73 = arith.subf %69, %72 : vector<1x8x8xf32>
    %74 = math.exp %73 : vector<1x8x8xf32>
    %cst_29 = arith.constant dense<0.000000e+00> : vector<1x8xf32>
    %75 = vector.multi_reduction <add>, %74, %cst_29 [2] : vector<1x8x8xf32> to vector<1x8xf32>
    %76 = vector.shape_cast %75 : vector<1x8xf32> to vector<1x8x1xf32>
    %77 = tpu.reciprocal %76 {approx = true} : vector<1x8x1xf32> -> vector<1x8x1xf32>
    %78 = vector.broadcast %77 : vector<1x8x1xf32> to vector<1x8x8xf32>
    %79 = arith.mulf %74, %78 : vector<1x8x8xf32>
    %80 = arith.truncf %79 : vector<1x8x8xf32> to vector<1x8x8xbf16>
    "tpu.trace_start"() <{level = 10 : i32, message = "bnm,bmd->bnd"}> : () -> ()
    %cst_30 = arith.constant dense<0.000000e+00> : vector<1x8x8xf32>
    %81 = tpu.matmul %80, %68, %cst_30 {dimension_numbers = #tpu.dot_dimension_numbers<[2], [1], [1], [2], [0, 0, 0, 1, 1, 2], [0], [0]>} : vector<1x8x8xbf16>, vector<1x8x8xbf16>, vector<1x8x8xf32> -> vector<1x8x8xf32>
    "tpu.trace_stop"() : () -> ()
    %82 = vector.shape_cast %81 : vector<1x8x8xf32> to vector<8x8xf32>
    %83 = arith.truncf %82 : vector<8x8xf32> to vector<8x8xbf16>
    %84 = vector.extract_strided_slice %64 {offsets = [0, 0], sizes = [8, 32], strides = [1, 1]} : vector<64x32xbf16> to vector<8x32xbf16>
    %cst_31 = arith.constant dense<0.000000e+00> : vector<8x32xf32>
    %85 = tpu.matmul %83, %84, %cst_31 {dimension_numbers = #tpu.dot_dimension_numbers<[1], [0], [0], [1], [0, 0, 1, 1], [], []>} : vector<8x8xbf16>, vector<8x32xbf16>, vector<8x32xf32> -> vector<8x32xf32>
    %86 = arith.addf %65, %85 : vector<8x32xf32>
    %87 = vector.extract_strided_slice %57 {offsets = [0, 0, 8], sizes = [1, 8, 8], strides = [1, 1, 1]} : vector<1x8x64xbf16> to vector<1x8x8xbf16>
    %88 = vector.extract_strided_slice %63 {offsets = [0, 8, 0], sizes = [1, 8, 8], strides = [1, 1, 1]} : vector<1x64x8xbf16> to vector<1x8x8xbf16>
    %89 = vector.extract_strided_slice %62 {offsets = [0, 0, 8], sizes = [1, 8, 8], strides = [1, 1, 1]} : vector<1x8x64xbf16> to vector<1x8x8xbf16>
    "tpu.trace_start"() <{level = 10 : i32, message = "bnd,bdm->bnm"}> : () -> ()
    %cst_32 = arith.constant dense<0.000000e+00> : vector<1x8x8xf32>
    %90 = tpu.matmul %87, %88, %cst_32 {dimension_numbers = #tpu.dot_dimension_numbers<[2], [1], [1], [2], [0, 0, 0, 1, 1, 2], [0], [0]>} : vector<1x8x8xbf16>, vector<1x8x8xbf16>, vector<1x8x8xf32> -> vector<1x8x8xf32>
    "tpu.trace_stop"() : () -> ()
    %cst_33 = arith.constant dense<0xFF800000> : vector<1x8xf32>
    %91 = vector.multi_reduction <maximumf>, %90, %cst_33 [2] : vector<1x8x8xf32> to vector<1x8xf32>
    %92 = vector.shape_cast %91 : vector<1x8xf32> to vector<1x8x1xf32>
    %93 = vector.broadcast %92 : vector<1x8x1xf32> to vector<1x8x8xf32>
    %94 = arith.subf %90, %93 : vector<1x8x8xf32>
    %95 = math.exp %94 : vector<1x8x8xf32>
    %cst_34 = arith.constant dense<0.000000e+00> : vector<1x8xf32>
    %96 = vector.multi_reduction <add>, %95, %cst_34 [2] : vector<1x8x8xf32> to vector<1x8xf32>
    %97 = vector.shape_cast %96 : vector<1x8xf32> to vector<1x8x1xf32>
    %98 = tpu.reciprocal %97 {approx = true} : vector<1x8x1xf32> -> vector<1x8x1xf32>
    %99 = vector.broadcast %98 : vector<1x8x1xf32> to vector<1x8x8xf32>
    %100 = arith.mulf %95, %99 : vector<1x8x8xf32>
    %101 = arith.truncf %100 : vector<1x8x8xf32> to vector<1x8x8xbf16>
    "tpu.trace_start"() <{level = 10 : i32, message = "bnm,bmd->bnd"}> : () -> ()
    %cst_35 = arith.constant dense<0.000000e+00> : vector<1x8x8xf32>
    %102 = tpu.matmul %101, %89, %cst_35 {dimension_numbers = #tpu.dot_dimension_numbers<[2], [1], [1], [2], [0, 0, 0, 1, 1, 2], [0], [0]>} : vector<1x8x8xbf16>, vector<1x8x8xbf16>, vector<1x8x8xf32> -> vector<1x8x8xf32>
    "tpu.trace_stop"() : () -> ()
    %103 = vector.shape_cast %102 : vector<1x8x8xf32> to vector<8x8xf32>
    %104 = arith.truncf %103 : vector<8x8xf32> to vector<8x8xbf16>
    %105 = vector.extract_strided_slice %64 {offsets = [8, 0], sizes = [8, 32], strides = [1, 1]} : vector<64x32xbf16> to vector<8x32xbf16>
    %cst_36 = arith.constant dense<0.000000e+00> : vector<8x32xf32>
    %106 = tpu.matmul %104, %105, %cst_36 {dimension_numbers = #tpu.dot_dimension_numbers<[1], [0], [0], [1], [0, 0, 1, 1], [], []>} : vector<8x8xbf16>, vector<8x32xbf16>, vector<8x32xf32> -> vector<8x32xf32>
    %107 = arith.addf %86, %106 : vector<8x32xf32>
    %108 = vector.extract_strided_slice %57 {offsets = [0, 0, 16], sizes = [1, 8, 8], strides = [1, 1, 1]} : vector<1x8x64xbf16> to vector<1x8x8xbf16>
    %109 = vector.extract_strided_slice %63 {offsets = [0, 16, 0], sizes = [1, 8, 8], strides = [1, 1, 1]} : vector<1x64x8xbf16> to vector<1x8x8xbf16>
    %110 = vector.extract_strided_slice %62 {offsets = [0, 0, 16], sizes = [1, 8, 8], strides = [1, 1, 1]} : vector<1x8x64xbf16> to vector<1x8x8xbf16>
    "tpu.trace_start"() <{level = 10 : i32, message = "bnd,bdm->bnm"}> : () -> ()
    %cst_37 = arith.constant dense<0.000000e+00> : vector<1x8x8xf32>
    %111 = tpu.matmul %108, %109, %cst_37 {dimension_numbers = #tpu.dot_dimension_numbers<[2], [1], [1], [2], [0, 0, 0, 1, 1, 2], [0], [0]>} : vector<1x8x8xbf16>, vector<1x8x8xbf16>, vector<1x8x8xf32> -> vector<1x8x8xf32>
    "tpu.trace_stop"() : () -> ()
    %cst_38 = arith.constant dense<0xFF800000> : vector<1x8xf32>
    %112 = vector.multi_reduction <maximumf>, %111, %cst_38 [2] : vector<1x8x8xf32> to vector<1x8xf32>
    %113 = vector.shape_cast %112 : vector<1x8xf32> to vector<1x8x1xf32>
    %114 = vector.broadcast %113 : vector<1x8x1xf32> to vector<1x8x8xf32>
    %115 = arith.subf %111, %114 : vector<1x8x8xf32>
    %116 = math.exp %115 : vector<1x8x8xf32>
    %cst_39 = arith.constant dense<0.000000e+00> : vector<1x8xf32>
    %117 = vector.multi_reduction <add>, %116, %cst_39 [2] : vector<1x8x8xf32> to vector<1x8xf32>
    %118 = vector.shape_cast %117 : vector<1x8xf32> to vector<1x8x1xf32>
    %119 = tpu.reciprocal %118 {approx = true} : vector<1x8x1xf32> -> vector<1x8x1xf32>
    %120 = vector.broadcast %119 : vector<1x8x1xf32> to vector<1x8x8xf32>
    %121 = arith.mulf %116, %120 : vector<1x8x8xf32>
    %122 = arith.truncf %121 : vector<1x8x8xf32> to vector<1x8x8xbf16>
    "tpu.trace_start"() <{level = 10 : i32, message = "bnm,bmd->bnd"}> : () -> ()
    %cst_40 = arith.constant dense<0.000000e+00> : vector<1x8x8xf32>
    %123 = tpu.matmul %122, %110, %cst_40 {dimension_numbers = #tpu.dot_dimension_numbers<[2], [1], [1], [2], [0, 0, 0, 1, 1, 2], [0], [0]>} : vector<1x8x8xbf16>, vector<1x8x8xbf16>, vector<1x8x8xf32> -> vector<1x8x8xf32>
    "tpu.trace_stop"() : () -> ()
    %124 = vector.shape_cast %123 : vector<1x8x8xf32> to vector<8x8xf32>
    %125 = arith.truncf %124 : vector<8x8xf32> to vector<8x8xbf16>
    %126 = vector.extract_strided_slice %64 {offsets = [16, 0], sizes = [8, 32], strides = [1, 1]} : vector<64x32xbf16> to vector<8x32xbf16>
    %cst_41 = arith.constant dense<0.000000e+00> : vector<8x32xf32>
    %127 = tpu.matmul %125, %126, %cst_41 {dimension_numbers = #tpu.dot_dimension_numbers<[1], [0], [0], [1], [0, 0, 1, 1], [], []>} : vector<8x8xbf16>, vector<8x32xbf16>, vector<8x32xf32> -> vector<8x32xf32>
    %128 = arith.addf %107, %127 : vector<8x32xf32>
    %129 = vector.extract_strided_slice %57 {offsets = [0, 0, 24], sizes = [1, 8, 8], strides = [1, 1, 1]} : vector<1x8x64xbf16> to vector<1x8x8xbf16>
    %130 = vector.extract_strided_slice %63 {offsets = [0, 24, 0], sizes = [1, 8, 8], strides = [1, 1, 1]} : vector<1x64x8xbf16> to vector<1x8x8xbf16>
    %131 = vector.extract_strided_slice %62 {offsets = [0, 0, 24], sizes = [1, 8, 8], strides = [1, 1, 1]} : vector<1x8x64xbf16> to vector<1x8x8xbf16>
    "tpu.trace_start"() <{level = 10 : i32, message = "bnd,bdm->bnm"}> : () -> ()
    %cst_42 = arith.constant dense<0.000000e+00> : vector<1x8x8xf32>
    %132 = tpu.matmul %129, %130, %cst_42 {dimension_numbers = #tpu.dot_dimension_numbers<[2], [1], [1], [2], [0, 0, 0, 1, 1, 2], [0], [0]>} : vector<1x8x8xbf16>, vector<1x8x8xbf16>, vector<1x8x8xf32> -> vector<1x8x8xf32>
    "tpu.trace_stop"() : () -> ()
    %cst_43 = arith.constant dense<0xFF800000> : vector<1x8xf32>
    %133 = vector.multi_reduction <maximumf>, %132, %cst_43 [2] : vector<1x8x8xf32> to vector<1x8xf32>
    %134 = vector.shape_cast %133 : vector<1x8xf32> to vector<1x8x1xf32>
    %135 = vector.broadcast %134 : vector<1x8x1xf32> to vector<1x8x8xf32>
    %136 = arith.subf %132, %135 : vector<1x8x8xf32>
    %137 = math.exp %136 : vector<1x8x8xf32>
    %cst_44 = arith.constant dense<0.000000e+00> : vector<1x8xf32>
    %138 = vector.multi_reduction <add>, %137, %cst_44 [2] : vector<1x8x8xf32> to vector<1x8xf32>
    %139 = vector.shape_cast %138 : vector<1x8xf32> to vector<1x8x1xf32>
    %140 = tpu.reciprocal %139 {approx = true} : vector<1x8x1xf32> -> vector<1x8x1xf32>
    %141 = vector.broadcast %140 : vector<1x8x1xf32> to vector<1x8x8xf32>
    %142 = arith.mulf %137, %141 : vector<1x8x8xf32>
    %143 = arith.truncf %142 : vector<1x8x8xf32> to vector<1x8x8xbf16>
    "tpu.trace_start"() <{level = 10 : i32, message = "bnm,bmd->bnd"}> : () -> ()
    %cst_45 = arith.constant dense<0.000000e+00> : vector<1x8x8xf32>
    %144 = tpu.matmul %143, %131, %cst_45 {dimension_numbers = #tpu.dot_dimension_numbers<[2], [1], [1], [2], [0, 0, 0, 1, 1, 2], [0], [0]>} : vector<1x8x8xbf16>, vector<1x8x8xbf16>, vector<1x8x8xf32> -> vector<1x8x8xf32>
    "tpu.trace_stop"() : () -> ()
    %145 = vector.shape_cast %144 : vector<1x8x8xf32> to vector<8x8xf32>
    %146 = arith.truncf %145 : vector<8x8xf32> to vector<8x8xbf16>
    %147 = vector.extract_strided_slice %64 {offsets = [24, 0], sizes = [8, 32], strides = [1, 1]} : vector<64x32xbf16> to vector<8x32xbf16>
    %cst_46 = arith.constant dense<0.000000e+00> : vector<8x32xf32>
    %148 = tpu.matmul %146, %147, %cst_46 {dimension_numbers = #tpu.dot_dimension_numbers<[1], [0], [0], [1], [0, 0, 1, 1], [], []>} : vector<8x8xbf16>, vector<8x32xbf16>, vector<8x32xf32> -> vector<8x32xf32>
    %149 = arith.addf %128, %148 : vector<8x32xf32>
    %150 = vector.extract_strided_slice %57 {offsets = [0, 0, 32], sizes = [1, 8, 8], strides = [1, 1, 1]} : vector<1x8x64xbf16> to vector<1x8x8xbf16>
    %151 = vector.extract_strided_slice %63 {offsets = [0, 32, 0], sizes = [1, 8, 8], strides = [1, 1, 1]} : vector<1x64x8xbf16> to vector<1x8x8xbf16>
    %152 = vector.extract_strided_slice %62 {offsets = [0, 0, 32], sizes = [1, 8, 8], strides = [1, 1, 1]} : vector<1x8x64xbf16> to vector<1x8x8xbf16>
    "tpu.trace_start"() <{level = 10 : i32, message = "bnd,bdm->bnm"}> : () -> ()
    %cst_47 = arith.constant dense<0.000000e+00> : vector<1x8x8xf32>
    %153 = tpu.matmul %150, %151, %cst_47 {dimension_numbers = #tpu.dot_dimension_numbers<[2], [1], [1], [2], [0, 0, 0, 1, 1, 2], [0], [0]>} : vector<1x8x8xbf16>, vector<1x8x8xbf16>, vector<1x8x8xf32> -> vector<1x8x8xf32>
    "tpu.trace_stop"() : () -> ()
    %cst_48 = arith.constant dense<0xFF800000> : vector<1x8xf32>
    %154 = vector.multi_reduction <maximumf>, %153, %cst_48 [2] : vector<1x8x8xf32> to vector<1x8xf32>
    %155 = vector.shape_cast %154 : vector<1x8xf32> to vector<1x8x1xf32>
    %156 = vector.broadcast %155 : vector<1x8x1xf32> to vector<1x8x8xf32>
    %157 = arith.subf %153, %156 : vector<1x8x8xf32>
    %158 = math.exp %157 : vector<1x8x8xf32>
    %cst_49 = arith.constant dense<0.000000e+00> : vector<1x8xf32>
    %159 = vector.multi_reduction <add>, %158, %cst_49 [2] : vector<1x8x8xf32> to vector<1x8xf32>
    %160 = vector.shape_cast %159 : vector<1x8xf32> to vector<1x8x1xf32>
    %161 = tpu.reciprocal %160 {approx = true} : vector<1x8x1xf32> -> vector<1x8x1xf32>
    %162 = vector.broadcast %161 : vector<1x8x1xf32> to vector<1x8x8xf32>
    %163 = arith.mulf %158, %162 : vector<1x8x8xf32>
    %164 = arith.truncf %163 : vector<1x8x8xf32> to vector<1x8x8xbf16>
    "tpu.trace_start"() <{level = 10 : i32, message = "bnm,bmd->bnd"}> : () -> ()
    %cst_50 = arith.constant dense<0.000000e+00> : vector<1x8x8xf32>
    %165 = tpu.matmul %164, %152, %cst_50 {dimension_numbers = #tpu.dot_dimension_numbers<[2], [1], [1], [2], [0, 0, 0, 1, 1, 2], [0], [0]>} : vector<1x8x8xbf16>, vector<1x8x8xbf16>, vector<1x8x8xf32> -> vector<1x8x8xf32>
    "tpu.trace_stop"() : () -> ()
    %166 = vector.shape_cast %165 : vector<1x8x8xf32> to vector<8x8xf32>
    %167 = arith.truncf %166 : vector<8x8xf32> to vector<8x8xbf16>
    %168 = vector.extract_strided_slice %64 {offsets = [32, 0], sizes = [8, 32], strides = [1, 1]} : vector<64x32xbf16> to vector<8x32xbf16>
    %cst_51 = arith.constant dense<0.000000e+00> : vector<8x32xf32>
    %169 = tpu.matmul %167, %168, %cst_51 {dimension_numbers = #tpu.dot_dimension_numbers<[1], [0], [0], [1], [0, 0, 1, 1], [], []>} : vector<8x8xbf16>, vector<8x32xbf16>, vector<8x32xf32> -> vector<8x32xf32>
    %170 = arith.addf %149, %169 : vector<8x32xf32>
    %171 = vector.extract_strided_slice %57 {offsets = [0, 0, 40], sizes = [1, 8, 8], strides = [1, 1, 1]} : vector<1x8x64xbf16> to vector<1x8x8xbf16>
    %172 = vector.extract_strided_slice %63 {offsets = [0, 40, 0], sizes = [1, 8, 8], strides = [1, 1, 1]} : vector<1x64x8xbf16> to vector<1x8x8xbf16>
    %173 = vector.extract_strided_slice %62 {offsets = [0, 0, 40], sizes = [1, 8, 8], strides = [1, 1, 1]} : vector<1x8x64xbf16> to vector<1x8x8xbf16>
    "tpu.trace_start"() <{level = 10 : i32, message = "bnd,bdm->bnm"}> : () -> ()
    %cst_52 = arith.constant dense<0.000000e+00> : vector<1x8x8xf32>
    %174 = tpu.matmul %171, %172, %cst_52 {dimension_numbers = #tpu.dot_dimension_numbers<[2], [1], [1], [2], [0, 0, 0, 1, 1, 2], [0], [0]>} : vector<1x8x8xbf16>, vector<1x8x8xbf16>, vector<1x8x8xf32> -> vector<1x8x8xf32>
    "tpu.trace_stop"() : () -> ()
    %cst_53 = arith.constant dense<0xFF800000> : vector<1x8xf32>
    %175 = vector.multi_reduction <maximumf>, %174, %cst_53 [2] : vector<1x8x8xf32> to vector<1x8xf32>
    %176 = vector.shape_cast %175 : vector<1x8xf32> to vector<1x8x1xf32>
    %177 = vector.broadcast %176 : vector<1x8x1xf32> to vector<1x8x8xf32>
    %178 = arith.subf %174, %177 : vector<1x8x8xf32>
    %179 = math.exp %178 : vector<1x8x8xf32>
    %cst_54 = arith.constant dense<0.000000e+00> : vector<1x8xf32>
    %180 = vector.multi_reduction <add>, %179, %cst_54 [2] : vector<1x8x8xf32> to vector<1x8xf32>
    %181 = vector.shape_cast %180 : vector<1x8xf32> to vector<1x8x1xf32>
    %182 = tpu.reciprocal %181 {approx = true} : vector<1x8x1xf32> -> vector<1x8x1xf32>
    %183 = vector.broadcast %182 : vector<1x8x1xf32> to vector<1x8x8xf32>
    %184 = arith.mulf %179, %183 : vector<1x8x8xf32>
    %185 = arith.truncf %184 : vector<1x8x8xf32> to vector<1x8x8xbf16>
    "tpu.trace_start"() <{level = 10 : i32, message = "bnm,bmd->bnd"}> : () -> ()
    %cst_55 = arith.constant dense<0.000000e+00> : vector<1x8x8xf32>
    %186 = tpu.matmul %185, %173, %cst_55 {dimension_numbers = #tpu.dot_dimension_numbers<[2], [1], [1], [2], [0, 0, 0, 1, 1, 2], [0], [0]>} : vector<1x8x8xbf16>, vector<1x8x8xbf16>, vector<1x8x8xf32> -> vector<1x8x8xf32>
    "tpu.trace_stop"() : () -> ()
    %187 = vector.shape_cast %186 : vector<1x8x8xf32> to vector<8x8xf32>
    %188 = arith.truncf %187 : vector<8x8xf32> to vector<8x8xbf16>
    %189 = vector.extract_strided_slice %64 {offsets = [40, 0], sizes = [8, 32], strides = [1, 1]} : vector<64x32xbf16> to vector<8x32xbf16>
    %cst_56 = arith.constant dense<0.000000e+00> : vector<8x32xf32>
    %190 = tpu.matmul %188, %189, %cst_56 {dimension_numbers = #tpu.dot_dimension_numbers<[1], [0], [0], [1], [0, 0, 1, 1], [], []>} : vector<8x8xbf16>, vector<8x32xbf16>, vector<8x32xf32> -> vector<8x32xf32>
    %191 = arith.addf %170, %190 : vector<8x32xf32>
    %192 = vector.extract_strided_slice %57 {offsets = [0, 0, 48], sizes = [1, 8, 8], strides = [1, 1, 1]} : vector<1x8x64xbf16> to vector<1x8x8xbf16>
    %193 = vector.extract_strided_slice %63 {offsets = [0, 48, 0], sizes = [1, 8, 8], strides = [1, 1, 1]} : vector<1x64x8xbf16> to vector<1x8x8xbf16>
    %194 = vector.extract_strided_slice %62 {offsets = [0, 0, 48], sizes = [1, 8, 8], strides = [1, 1, 1]} : vector<1x8x64xbf16> to vector<1x8x8xbf16>
    "tpu.trace_start"() <{level = 10 : i32, message = "bnd,bdm->bnm"}> : () -> ()
    %cst_57 = arith.constant dense<0.000000e+00> : vector<1x8x8xf32>
    %195 = tpu.matmul %192, %193, %cst_57 {dimension_numbers = #tpu.dot_dimension_numbers<[2], [1], [1], [2], [0, 0, 0, 1, 1, 2], [0], [0]>} : vector<1x8x8xbf16>, vector<1x8x8xbf16>, vector<1x8x8xf32> -> vector<1x8x8xf32>
    "tpu.trace_stop"() : () -> ()
    %cst_58 = arith.constant dense<0xFF800000> : vector<1x8xf32>
    %196 = vector.multi_reduction <maximumf>, %195, %cst_58 [2] : vector<1x8x8xf32> to vector<1x8xf32>
    %197 = vector.shape_cast %196 : vector<1x8xf32> to vector<1x8x1xf32>
    %198 = vector.broadcast %197 : vector<1x8x1xf32> to vector<1x8x8xf32>
    %199 = arith.subf %195, %198 : vector<1x8x8xf32>
    %200 = math.exp %199 : vector<1x8x8xf32>
    %cst_59 = arith.constant dense<0.000000e+00> : vector<1x8xf32>
    %201 = vector.multi_reduction <add>, %200, %cst_59 [2] : vector<1x8x8xf32> to vector<1x8xf32>
    %202 = vector.shape_cast %201 : vector<1x8xf32> to vector<1x8x1xf32>
    %203 = tpu.reciprocal %202 {approx = true} : vector<1x8x1xf32> -> vector<1x8x1xf32>
    %204 = vector.broadcast %203 : vector<1x8x1xf32> to vector<1x8x8xf32>
    %205 = arith.mulf %200, %204 : vector<1x8x8xf32>
    %206 = arith.truncf %205 : vector<1x8x8xf32> to vector<1x8x8xbf16>
    "tpu.trace_start"() <{level = 10 : i32, message = "bnm,bmd->bnd"}> : () -> ()
    %cst_60 = arith.constant dense<0.000000e+00> : vector<1x8x8xf32>
    %207 = tpu.matmul %206, %194, %cst_60 {dimension_numbers = #tpu.dot_dimension_numbers<[2], [1], [1], [2], [0, 0, 0, 1, 1, 2], [0], [0]>} : vector<1x8x8xbf16>, vector<1x8x8xbf16>, vector<1x8x8xf32> -> vector<1x8x8xf32>
    "tpu.trace_stop"() : () -> ()
    %208 = vector.shape_cast %207 : vector<1x8x8xf32> to vector<8x8xf32>
    %209 = arith.truncf %208 : vector<8x8xf32> to vector<8x8xbf16>
    %210 = vector.extract_strided_slice %64 {offsets = [48, 0], sizes = [8, 32], strides = [1, 1]} : vector<64x32xbf16> to vector<8x32xbf16>
    %cst_61 = arith.constant dense<0.000000e+00> : vector<8x32xf32>
    %211 = tpu.matmul %209, %210, %cst_61 {dimension_numbers = #tpu.dot_dimension_numbers<[1], [0], [0], [1], [0, 0, 1, 1], [], []>} : vector<8x8xbf16>, vector<8x32xbf16>, vector<8x32xf32> -> vector<8x32xf32>
    %212 = arith.addf %191, %211 : vector<8x32xf32>
    %213 = vector.extract_strided_slice %57 {offsets = [0, 0, 56], sizes = [1, 8, 8], strides = [1, 1, 1]} : vector<1x8x64xbf16> to vector<1x8x8xbf16>
    %214 = vector.extract_strided_slice %63 {offsets = [0, 56, 0], sizes = [1, 8, 8], strides = [1, 1, 1]} : vector<1x64x8xbf16> to vector<1x8x8xbf16>
    %215 = vector.extract_strided_slice %62 {offsets = [0, 0, 56], sizes = [1, 8, 8], strides = [1, 1, 1]} : vector<1x8x64xbf16> to vector<1x8x8xbf16>
    "tpu.trace_start"() <{level = 10 : i32, message = "bnd,bdm->bnm"}> : () -> ()
    %cst_62 = arith.constant dense<0.000000e+00> : vector<1x8x8xf32>
    %216 = tpu.matmul %213, %214, %cst_62 {dimension_numbers = #tpu.dot_dimension_numbers<[2], [1], [1], [2], [0, 0, 0, 1, 1, 2], [0], [0]>} : vector<1x8x8xbf16>, vector<1x8x8xbf16>, vector<1x8x8xf32> -> vector<1x8x8xf32>
    "tpu.trace_stop"() : () -> ()
    %cst_63 = arith.constant dense<0xFF800000> : vector<1x8xf32>
    %217 = vector.multi_reduction <maximumf>, %216, %cst_63 [2] : vector<1x8x8xf32> to vector<1x8xf32>
    %218 = vector.shape_cast %217 : vector<1x8xf32> to vector<1x8x1xf32>
    %219 = vector.broadcast %218 : vector<1x8x1xf32> to vector<1x8x8xf32>
    %220 = arith.subf %216, %219 : vector<1x8x8xf32>
    %221 = math.exp %220 : vector<1x8x8xf32>
    %cst_64 = arith.constant dense<0.000000e+00> : vector<1x8xf32>
    %222 = vector.multi_reduction <add>, %221, %cst_64 [2] : vector<1x8x8xf32> to vector<1x8xf32>
    %223 = vector.shape_cast %222 : vector<1x8xf32> to vector<1x8x1xf32>
    %224 = tpu.reciprocal %223 {approx = true} : vector<1x8x1xf32> -> vector<1x8x1xf32>
    %225 = vector.broadcast %224 : vector<1x8x1xf32> to vector<1x8x8xf32>
    %226 = arith.mulf %221, %225 : vector<1x8x8xf32>
    %227 = arith.truncf %226 : vector<1x8x8xf32> to vector<1x8x8xbf16>
    "tpu.trace_start"() <{level = 10 : i32, message = "bnm,bmd->bnd"}> : () -> ()
    %cst_65 = arith.constant dense<0.000000e+00> : vector<1x8x8xf32>
    %228 = tpu.matmul %227, %215, %cst_65 {dimension_numbers = #tpu.dot_dimension_numbers<[2], [1], [1], [2], [0, 0, 0, 1, 1, 2], [0], [0]>} : vector<1x8x8xbf16>, vector<1x8x8xbf16>, vector<1x8x8xf32> -> vector<1x8x8xf32>
    "tpu.trace_stop"() : () -> ()
    %229 = vector.shape_cast %228 : vector<1x8x8xf32> to vector<8x8xf32>
    %230 = arith.truncf %229 : vector<8x8xf32> to vector<8x8xbf16>
    %231 = vector.extract_strided_slice %64 {offsets = [56, 0], sizes = [8, 32], strides = [1, 1]} : vector<64x32xbf16> to vector<8x32xbf16>
    %cst_66 = arith.constant dense<0.000000e+00> : vector<8x32xf32>
    %232 = tpu.matmul %230, %231, %cst_66 {dimension_numbers = #tpu.dot_dimension_numbers<[1], [0], [0], [1], [0, 0, 1, 1], [], []>} : vector<8x8xbf16>, vector<8x32xbf16>, vector<8x32xf32> -> vector<8x32xf32>
    %233 = arith.addf %212, %232 : vector<8x32xf32>
    %c0_67 = arith.constant 0 : index
    %c0_68 = arith.constant 0 : index
    %234 = vector.load %arg8[%c0_67, %c0_68] : memref<1x32xf32, #tpu.memory_space<vmem>>, vector<1x32xf32>
    %235 = vector.broadcast %234 : vector<1x32xf32> to vector<8x32xf32>
    %236 = arith.addf %233, %235 : vector<8x32xf32>
    %237 = vector.shape_cast %236 : vector<8x32xf32> to vector<1x8x32xf32>
    %c0_69 = arith.constant 0 : index
    %c0_70 = arith.constant 0 : index
    %c0_71 = arith.constant 0 : index
    %238 = vector.load %arg9[%c0_69, %c0_70, %c0_71] : memref<1x8x32xf32, #tpu.memory_space<vmem>>, vector<1x8x32xf32>
    tpu.vector_store %arg9[%c0_69, %c0_70, %c0_71], %237 {strides = array<i32>} : memref<1x8x32xf32, #tpu.memory_space<vmem>>, vector<1x8x32xf32>,
    return
  }
  func.func @transform_0(%arg0: i32) -> (i32, i32, i32) {
    %c0_i32 = arith.constant 0 : i32
    %c0_i32_0 = arith.constant 0 : i32
    %c0_i32_1 = arith.constant 0 : i32
    return %arg0, %c0_i32, %c0_i32_0 : i32, i32, i32
  }
  func.func @transform_1(%arg0: i32) -> (i32, i32, i32) {
    %c0_i32 = arith.constant 0 : i32
    %c0_i32_0 = arith.constant 0 : i32
    %c0_i32_1 = arith.constant 0 : i32
    return %arg0, %c0_i32, %c0_i32_0 : i32, i32, i32
  }
  func.func @transform_2(%arg0: i32) -> (i32, i32) {
    %c0_i32 = arith.constant 0 : i32
    %c0_i32_0 = arith.constant 0 : i32
    %c0_i32_1 = arith.constant 0 : i32
    return %c0_i32, %c0_i32_0 : i32, i32
  }
  func.func @transform_3(%arg0: i32) -> (i32, i32) {
    %c0_i32 = arith.constant 0 : i32
    %c0_i32_0 = arith.constant 0 : i32
    %c0_i32_1 = arith.constant 0 : i32
    return %c0_i32, %c0_i32_0 : i32, i32
  }
  func.func @transform_4(%arg0: i32) -> (i32, i32) {
    %c0_i32 = arith.constant 0 : i32
    %c0_i32_0 = arith.constant 0 : i32
    %c0_i32_1 = arith.constant 0 : i32
    return %c0_i32, %c0_i32_0 : i32, i32
  }
  func.func @transform_5(%arg0: i32) -> (i32, i32) {
    %c0_i32 = arith.constant 0 : i32
    %c0_i32_0 = arith.constant 0 : i32
    %c0_i32_1 = arith.constant 0 : i32
    return %c0_i32, %c0_i32_0 : i32, i32
  }
  func.func @transform_6(%arg0: i32) -> (i32, i32) {
    %c0_i32 = arith.constant 0 : i32
    %c0_i32_0 = arith.constant 0 : i32
    %c0_i32_1 = arith.constant 0 : i32
    return %c0_i32, %c0_i32_0 : i32, i32
  }
  func.func @transform_7(%arg0: i32) -> (i32, i32) {
    %c0_i32 = arith.constant 0 : i32
    %c0_i32_0 = arith.constant 0 : i32
    %c0_i32_1 = arith.constant 0 : i32
    return %c0_i32, %c0_i32_0 : i32, i32
  }
  func.func @transform_8(%arg0: i32) -> (i32, i32, i32) {
    %c0_i32 = arith.constant 0 : i32
    %c0_i32_0 = arith.constant 0 : i32
    %c0_i32_1 = arith.constant 0 : i32
    return %arg0, %c0_i32, %c0_i32_0 : i32, i32, i32
  }
}

</mosaic_0001>

<bundles_post_ra>
// kernel: tpu_custom_call.1
= control target key start
LH: loop header
LB: loop body
LE: loop exit
PB: predicated region body
PF: predicated region fallthrough
CT: control target
= control target key end

     0   :  { %13 = vsyncpa [#allocation3], 0  ;;  %s2662_s0 = inlined_call_operand.vmem [shape: bf16[2,8,32], index: 0, kind: input, shape index: {}]   ;;  %s2663_s1 = inlined_call_operand.vmem [shape: bf16[2,8,32], index: 1, kind: input, shape index: {}]   ;;  %s2664_s2 = inlined_call_operand.vmem [shape: bf16[1,32], index: 2, kind: input, shape index: {}]   ;;  %s2665_s3 = inlined_call_operand.vmem [shape: bf16[1,32], index: 3, kind: input, shape index: {}]   ;;  %s2666_s4 = inlined_call_operand.vmem [shape: bf16[32,64], index: 4, kind: input, shape index: {}]   ;;  %s2667_s5 = inlined_call_operand.vmem [shape: bf16[32,128], index: 5, kind: input, shape index: {}]   ;;  %s2668_s6 = inlined_call_operand.vmem [shape: bf16[64,32], index: 6, kind: input, shape index: {}]   ;;  %s2669_s7 = inlined_call_operand.vmem [shape: f32[1,32], index: 7, kind: input, shape index: {}]   ;;  %s2670_s8 = inlined_call_operand.hbm [shape: f32[2,8,32], index: 8, kind: output, shape index: {}]  }
   0x1   :  { %15 = vsyncpa [#allocation3 + $0x1], 0  ;;  %s2332_s27 = smov 0   ;;  %s2334_s28 = smov 0  }
   0x2   :  { %s2336_s29 = smov 0   ;;  %s2338_s30 = smov 0  }
   0x3 LB: > { %s2353_s9 = sadd.s32 4294967295, %s2267_s30   ;;  %s1853_s10 = sadd.s32 4294967294, %s2267_s30   ;;  %s2267_s30 = sphi %s2338_s30, %s2676_s30   ;;  %s2263_s29 = sphi %s2336_s29, %s2675_s29   ;;  %s2259_s28 = sphi %s2334_s28, %s2674_s28   ;;  %s2255_s27 = sphi %s2332_s27, %s2673_s27  }
   0x4   : > { %s2357_s11 = sadd.s32 1, %s2267_s30   ;;  %s206_s12 = sadd.s32 1, %s2263_s29 }
   0x5   : > { %s203_s13 = ssub.s32 %s2267_s30, %s2357_s11  ;;  %p216_p0 = scmp.ne.s32.totalorder %s2263_s29, %s2259_s28 }
   0x6   : > { %p204_p1 = scmp.eq.s32.totalorder %s203_s13, 0  ;;  %p217_p2 = scmp.eq.s32.totalorder %s2353_s9, 1 }
   0x7   : > { %p222_p3 = scmp.ne.s32.totalorder %s2259_s28, %s2255_s27  ;;  %p223_p4 = scmp.eq.s32.totalorder %s1853_s10, 1 }
   0x8   : > { %s2368_s14 = scalar_select %p204_p1, %s2263_s29, %s206_s12  }
   0x9   : > { %p2370_p5 = por %p217_p2, %p216_p0  ;;  %p2374_p6 = por %p223_p4, %p222_p3 }
   0xa   : > { %p1856_p7 = scmp.ge.s32.totalorder %s2267_s30, 1  ;;  %p273_p8 = scmp.lt.s32.totalorder %s2267_s30, 3 }
   0xc   : > { %p274_p9 = pnand %p1856_p7, %p273_p8 }
   0xd   : > { %p310_p10 = scmp.lt.s32.totalorder (!%p274_p9), %s2353_s9, 1  ;;  %vm327_vm0 = vcmask (!%p274_p9), 261120   ;;  %v2165_v16 = vld [vmem:[%s2667_s5] sm:$0xff] (!%p274_p9)   ;;  %v2269_v18 = vmov (!%p274_p9), 0.0   ;;  %v2167_v19 = vld [vmem:[%s2667_s5 + $0x8] sm:$0xff] (!%p274_p9)   ;;  %vm2270_vm1 = vmmov (!%p274_p9), 0   ;;  %v342_v23 = vlaneseq (!%p274_p9) }
   0xe   : > { %277 = sbr.rel (%p274_p9) target bundleno = 5082 (0x13da), region = 52  ;;  %v2166_v17 = vld [vmem:[%s2666_s4] sm:$0xff] (!%p274_p9)   ;;  %1957 = vmatprep.subr.bf16.mxu1 (!%p274_p9), %v2269_v18  ;;  %1949 = vmatprep.subr.bf16.mxu0 (!%p274_p9), %v2269_v18  ;;  %v2168_v20 = vld [vmem:[%s2666_s4 + $0x8] sm:$0xff] (!%p274_p9)   ;;  %vm497_vm2 = vcmask (!%p274_p9), 64512   ;;  %s2272_s25 = smov (!%p274_p9), 64   ;;  %vm562_vm3 = vcmask (!%p274_p9), 1043456  }
   0xf   : > { %1958 = vmatpush3.bf16.msra.mxu1 (!%p274_p9), %v2165_v16  ;;  %1950 = vmatpush3.bf16.msra.mxu0 (!%p274_p9), %v2166_v17  ;;  %v343_v27 = vshrl.u32 (!%p274_p9), %v342_v23, 7  ;;  %v319_v29 = vld [vmem:[%s2664_s2] sm:$0x1] (!%p274_p9)  ;;  %s2273_s26 = smov (!%p274_p9), 56   ;;  %s2274_s10 = smov (!%p274_p9), 112  }
  0x10   : > { %1959 = vmatprep.subr.bf16.mxu1 (!%p274_p9), %v2269_v18  ;;  %1961 = vmatprep.mubr.msk.bf16.mxu1 (!%p274_p9), %vm2270_vm1, %v2269_v18  ;;  %v321_v30 = vld [vmem:[%s2665_s3] sm:$0x1] (!%p274_p9)  ;;  %v320_v31 = vunpack.c.l.bf16 (!%p274_p9), %v319_v29  ;;  %v490_v23 = vld [vmem:[%s2668_s6 + $0x4] sm:$0xf] (!%p274_p9)  ;;  %s2275_s19 = smov (!%p274_p9), 48   ;;  %s2276_s20 = smov (!%p274_p9), 104  }
  0x11   : > { %1951 = vmatprep.subr.bf16.mxu0 (!%p274_p9), %v2269_v18  ;;  %1953 = vmatprep.mubr.msk.bf16.mxu0 (!%p274_p9), %vm2270_vm1, %v2269_v18  ;;  %v344_v32 = vsub.s32 (!%p274_p9), 0, %v343_v27  ;;  %v322_v33 = vunpack.c.l.bf16 (!%p274_p9), %v321_v30  ;;  %v489_v29 = vld [vmem:[%s2668_s6] sm:$0xf] (!%p274_p9)  ;;  %s2277_s23 = smov (!%p274_p9), 96   ;;  %s2280_s12 = smov (!%p274_p9), 88  }
  0x12   : > { %s2283_s22 = smov (!%p274_p9), 16   ;;  %s307_s13 = sand.u32 (!%p274_p9), 1, %s2259_s28  }
  0x13   : > { %1960 = vmatpush3.bf16.msra.mxu1 (!%p274_p9), %v2167_v19  ;;  %1952 = vmatpush3.bf16.msra.mxu0 (!%p274_p9), %v2168_v20  ;;  %v345_v34 = vrot.slane (!%p274_p9), %v320_v31, %v344_v32  ;;  %v350_v36 = vrot.slane (!%p274_p9), %v322_v33, %v344_v32  ;;  %v769_v32 = vsel (!%p274_p9), %vm562_vm3, %v489_v29, 0 }
  0x14   : > { %1971 = vmatprep.subr.bf16.mxu1 (!%p274_p9), %v2269_v18  ;;  %1965 = vmatprep.subr.bf16.mxu0 (!%p274_p9), %v2269_v18 }
  0x15   : > { %s311_s17 = scalar_select %p310_p10, %s2353_s9, 1 }
  0x17   : > { %s1858_s18 = sshll.u32 %s311_s17, 2  ;;  %s1857_s17 = sshll.u32 %s307_s13, 3 }
  0x18   : > { %s317_s21 = scalar_lea.vmem %s2663_s1, %s1858_s18  ;;  %s313_s24 = scalar_lea.vmem %s2662_s0, %s1858_s18 }
  0x19   : > { %v325_v0 = vld [vmem:[%s317_s21] sm:$0xf]  ;;  %s2281_s18 = smov 80   ;;  %s309_s21 = scalar_lea.vmem [#allocation2], %s1857_s17 }
  0x1a   : > { %v323_v1 = vld [vmem:[%s313_s24] sm:$0xf]  ;;  %v326_v2 = vunpack.c.l.bf16 %v325_v0  ;;  %s2271_s24 = smov 120  }
  0x1b   : > { %v324_v3 = vunpack.c.l.bf16 %v323_v1 }
  0x1c   : > { %v353_v4 = vsel %vm327_vm0, %v326_v2, 0.0 }
  0x1d   : > { %354 = vadd.xlane.f32.xlu0 %v353_v4  ;;  %v328_v5 = vsel %vm327_vm0, %v324_v3, 0.0 }
  0x21   : > { %329 = vadd.xlane.f32.xlu0 %v328_v5 }
  0xaa   : > { %v355_v6 = vpop.xlane.xlu0 %354 }
  0xab   : > { %v356_v7 = vmul.f32 0.03125, %v355_v6 }
  0xad   : > { %v357_v8 = vsub.f32 %v326_v2, %v356_v7 }
  0xae   : > { %v330_v9 = vpop.xlane.xlu0 %329 }
  0xaf   : > { %v332_v10 = vmul.f32 0.03125, %v330_v9  ;;  %v358_v11 = vmul.f32 %v357_v8, %v357_v8 }
  0xb1   : > { %v333_v12 = vsub.f32 %v324_v3, %v332_v10  ;;  %v359_v13 = vsel %vm327_vm0, %v358_v11, 0.0 }
  0xb2   : > { %360 = vadd.xlane.f32.xlu1 %v359_v13 }
  0xb3   : > { %v334_v14 = vmul.f32 %v333_v12, %v333_v12 }
  0xb5   : > { %v335_v15 = vsel %vm327_vm0, %v334_v14, 0.0 }
  0xb6   : > { %336 = vadd.xlane.f32.xlu1 %v335_v15 }
 0x13f   : > { %v361_v21 = vpop.xlane.xlu1 %360 }
 0x140   : > { %v362_v22 = vmul.f32 0.03125, %v361_v21 }
 0x142   : > { %v363_v24 = vadd.f32 1e-05, %v362_v22 }
 0x143   : > { %v337_v25 = vpop.xlane.xlu1 %336 }
 0x144   : > { %2169 = vrsqrt.f32 %v363_v24  ;;  %v338_v26 = vmul.f32 0.03125, %v337_v25  ;;  %v723_v24 = vsel %vm562_vm3, %v490_v23, 0 }
 0x146   : > { %v339_v28 = vadd.f32 1e-05, %v338_v26 }
 0x148   : > { %2171 = vrsqrt.f32 %v339_v28 }
 0x14e   : > { %v2170_v35 = vpop.eup %2169 }
 0x14f   : > { %v365_v37 = vmul.f32 %v2170_v35, %v357_v8 }
 0x151   : > { %v366_v38 = vmul.f32 %v365_v37, %v345_v34 }
 0x152   : > { %v2172_v39 = vpop.eup %2171 }
 0x153   : > { %v367_v40 = vadd.f32 %v366_v38, %v350_v36  ;;  %v341_v41 = vmul.f32 %v2172_v39, %v333_v12 }
 0x155   : > { %v368_v42 = vpack.c.bf16 %v367_v40, %v367_v40  ;;  %v346_v43 = vmul.f32 %v345_v34, %v341_v41 }
 0x157   : > { %1962 = vmatmul.mubr.msk.bf16.vlgmr.msra.gmra.mrb[0].mxu1 %vm327_vm0, %v368_v42  ;;  %v351_v44 = vadd.f32 %v350_v36, %v346_v43 }
 0x158   : > { %1973 = vmatprep.mubr.msk.bf16.mxu1 %vm2270_vm1, %v2269_v18 }
 0x159   : > { %v352_v45 = vpack.c.bf16 %v351_v44, %v351_v44 }
 0x15b   : > { %1954 = vmatmul.mubr.msk.bf16.vlgmr.msra.gmra.mrb[0].mxu0 %vm327_vm0, %v352_v45 }
 0x15c   : > { %1967 = vmatprep.mubr.msk.bf16.mxu0 %vm2270_vm1, %v2269_v18 }
 0x22a   : > { %v481_v46 = vpop.f32.mrb[0].mxu1 }
 0x22b   : > { %v2426_v47 = vpack.c.bf16 %v481_v46, %v481_v46  ;;  %v1963_v48 = vpop.f32.mrb[1].mxu1 }
 0x22c   : > { %v484_v49 = vpop.f32.mrb[2].mxu1 }
 0x22d   : > { %v1964_v50 = vpop.f32.mrb[3].mxu1  ;;  %610 = vrot.lane.b32.xlu0 %v2426_v47, %s2271_s24  ;;  %v502_v51 = vsel %vm497_vm2, %v2426_v47, 0 }
 0x22e   : > { %v422_v52 = vpop.f32.mrb[0].mxu0  ;;  %1966 = vmatpush3.bf16.xpose.msra.mxu0 %v502_v51 }
 0x22f   : > { %v2431_v53 = vpack.c.bf16 %v422_v52, %v422_v52  ;;  %v1955_v54 = vpop.f32.mrb[1].mxu0  ;;  %1977 = vmatprep.subr.bf16.mxu0 %v2269_v18 }
 0x230   : > { %v425_v55 = vpop.f32.mrb[2].mxu0 }
 0x231   : > { %608 = vrot.lane.b32.xlu1 %v2431_v53, %s2271_s24  ;;  %v1956_v56 = vpop.f32.mrb[3].mxu0  ;;  %s2278_s24 = smov 40  }
 0x235   : > { %1968 = vmatmul.mubr.msk.bf16.vlgmr.msra.gmra.mrb[4].mxu0 %vm497_vm2, %v2431_v53 }
 0x236   : > { %1979 = vmatprep.mubr.msk.bf16.mxu0 %vm2270_vm1, %v2269_v18 }
 0x29f   : > { %v611_v57 = vpop.permute.xlu0 %610 }
 0x2a0   : > { %v616_v58 = vsel %vm497_vm2, %v611_v57, 0 }
 0x2a1   : > { %1978 = vmatpush3.bf16.xpose.msra.mxu0 %v616_v58 }
 0x2a2   : > { %1989 = vmatprep.subr.bf16.mxu0 %v2269_v18 }
 0x2a3   : > { %v609_v59 = vpop.permute.xlu1 %608 }
 0x2a8   : > { %1980 = vmatmul.mubr.msk.bf16.vlgmr.msra.gmra.mrb[8].mxu0 %vm497_vm2, %v609_v59 }
 0x2a9   : > { %1991 = vmatprep.mubr.msk.bf16.mxu0 %vm2270_vm1, %v2269_v18  ;;  %1990 = vmatpush3.bf16.msra.mxu0 %v723_v24 }
 0x2aa   : > { %2001 = vmatprep.subr.bf16.mxu0 %v2269_v18 }
 0x308   : > { %v538_v60 = vpop.f32.mrb[4].mxu0 }
 0x309   : > { %v1969_v61 = vpop.f32.mrb[5].mxu0  ;;  %v544_v62 = vsel %vm497_vm2, %v538_v60, -inf }
 0x30a   : > { %545 = vmax.xlane.f32.xlu1 %v544_v62  ;;  %v541_v63 = vpop.f32.mrb[6].mxu0 }
 0x30b   : > { %v1970_v0 = vpop.f32.mrb[7].mxu0 }
 0x37b   : > { %v652_v1 = vpop.f32.mrb[8].mxu0 }
 0x37c   : > { %v1981_v2 = vpop.f32.mrb[9].mxu0  ;;  %v658_v3 = vsel %vm497_vm2, %v652_v1, -inf }
 0x37d   : > { %659 = vmax.xlane.f32.xlu0 %v658_v3  ;;  %v655_v4 = vpop.f32.mrb[10].mxu0 }
 0x37e   : > { %v1982_v5 = vpop.f32.mrb[11].mxu0 }
 0x397   : > { %v546_v6 = vpop.xlane.xlu1 %545 }
 0x398   : > { %v547_v7 = vsub.f32 %v538_v60, %v546_v6 }
 0x39a   : > { %v548_v8 = vmul.f32 1.442695, %v547_v7 }
 0x39c   : > { %2173 = vpow2.f32 %v548_v8 }
 0x3a6   : > { %v2174_v9 = vpop.eup %2173 }
 0x3a7   : > { %v550_v10 = vsel %vm497_vm2, %v2174_v9, 0.0 }
 0x3a8   : > { %551 = vadd.xlane.f32.xlu0 %v550_v10 }
 0x3be   : > { %557 = vrot.lane.b32.xlu0 %v2426_v47, %s2272_s25 }
 0x40a   : > { %v660_v11 = vpop.xlane.xlu0 %659 }
 0x40b   : > { %v661_v12 = vsub.f32 %v652_v1, %v660_v11 }
 0x40d   : > { %v662_v13 = vmul.f32 1.442695, %v661_v12  ;;  %v491_v12 = vld [vmem:[%s2668_s6 + $0x8] sm:$0xf] }
 0x40f   : > { %2175 = vpow2.f32 %v662_v13  ;;  %v926_v13 = vsel %vm562_vm3, %v491_v12, 0 }
 0x419   : > { %v2176_v14 = vpop.eup %2175 }
 0x41a   : > { %v664_v15 = vsel %vm497_vm2, %v2176_v14, 0.0 }
 0x41b   : > { %665 = vadd.xlane.f32.xlu1 %v664_v15 }
 0x42c   : > { %670 = vrot.lane.b32.xlu1 %v2426_v47, %s2273_s26  ;;  %s2285_s26 = smov 8  }
 0x430   : > { %813 = vrot.lane.b32.xlu1 %v2426_v47, %s2274_s10 }
 0x434   : > { %811 = vrot.lane.b32.xlu1 %v2431_v53, %s2274_s10  ;;  %s2279_s10 = smov 32  }
 0x435   : > { %v552_v16 = vpop.xlane.xlu0 %551 }
 0x436   : > { %2177 = vrcp.f32 %v552_v16 }
 0x439   : > { %v558_v17 = vpop.permute.xlu0 %557 }
 0x43a   : > { %v564_v19 = vsel %vm562_vm3, %v558_v17, 0 }
 0x43b   : > { %1972 = vmatpush3.bf16.msra.mxu1 %v564_v19 }
 0x43c   : > { %1983 = vmatprep.subr.bf16.mxu1 %v2269_v18 }
 0x440   : > { %v2178_v20 = vpop.eup %2177 }
 0x441   : > { %v554_v21 = vmul.f32 %v2178_v20, %v2174_v9 }
 0x443   : > { %v555_v22 = vpack.c.bf16 %v554_v21, %v554_v21 }
 0x445   : > { %1974 = vmatmul.mubr.msk.bf16.vlgmr.msra.gmra.mrb[4].mxu1 %vm497_vm2, %v555_v22 }
 0x446   : > { %1985 = vmatprep.mubr.msk.bf16.mxu1 %vm2270_vm1, %v2269_v18 }
 0x4a8   : > { %v666_v25 = vpop.xlane.xlu1 %665 }
 0x4a9   : > { %2179 = vrcp.f32 %v666_v25 }
 0x4ac   : > { %v671_v26 = vpop.permute.xlu1 %670 }
 0x4ad   : > { %v676_v27 = vsel %vm562_vm3, %v671_v26, 0 }
 0x4ae   : > { %1984 = vmatpush3.bf16.msra.mxu1 %v676_v27 }
 0x4af   : > { %1995 = vmatprep.subr.bf16.mxu1 %v2269_v18 }
 0x4b0   : > { %v814_v38 = vpop.permute.xlu1 %813 }
 0x4b1   : > { %v819_v43 = vsel %vm497_vm2, %v814_v38, 0 }
 0x4b3   : > { %v2180_v28 = vpop.eup %2179 }
 0x4b4   : > { %v668_v30 = vmul.f32 %v2180_v28, %v2176_v14  ;;  %v812_v45 = vpop.permute.xlu1 %811 }
 0x4b6   : > { %v669_v31 = vpack.c.bf16 %v668_v30, %v668_v30 }
 0x4b8   : > { %1986 = vmatmul.mubr.msk.bf16.vlgmr.msra.gmra.mrb[8].mxu1 %vm497_vm2, %v669_v31 }
 0x4b9   : > { %1996 = vmatpush3.bf16.msra.mxu1 %v769_v32  ;;  %1997 = vmatprep.mubr.msk.bf16.mxu1 %vm2270_vm1, %v2269_v18 }
 0x4ba   : > { %2007 = vmatprep.subr.bf16.mxu1 %v2269_v18 }
 0x518   : > { %v600_v33 = vpop.f32.mrb[4].mxu1 }
 0x519   : > { %v606_v34 = vpack.c.bf16 %v600_v33, %v600_v33  ;;  %v1975_v35 = vpop.f32.mrb[5].mxu1 }
 0x51a   : > { %v603_v36 = vpop.f32.mrb[6].mxu1 }
 0x51b   : > { %v1976_v37 = vpop.f32.mrb[7].mxu1  ;;  %1998 = vmatmul.mubr.msk.bf16.vlgmr.msra.gmra.mrb[12].mxu1 %vm497_vm2, %v606_v34 }
 0x51c   : > { %2009 = vmatprep.mubr.msk.bf16.mxu1 %vm2270_vm1, %v2269_v18 }
 0x58b   : > { %v712_v39 = vpop.f32.mrb[8].mxu1 }
 0x58c   : > { %v718_v40 = vpack.c.bf16 %v712_v39, %v712_v39  ;;  %v1987_v41 = vpop.f32.mrb[9].mxu1 }
 0x58d   : > { %v715_v42 = vpop.f32.mrb[10].mxu1 }
 0x58e   : > { %v1988_v44 = vpop.f32.mrb[11].mxu1  ;;  %1992 = vmatmul.mubr.msk.bf16.vlgmr.msra.gmra.mrb[12].mxu0 %vm497_vm2, %v718_v40 }
 0x58f   : > { %2002 = vmatpush3.bf16.xpose.msra.mxu0 %v819_v43  ;;  %2003 = vmatprep.mubr.msk.bf16.mxu0 %vm2270_vm1, %v2269_v18  ;;  %v492_v44 = vld [vmem:[%s2668_s6 + $0xc] sm:$0xf] }
 0x590   : > { %2013 = vmatprep.subr.bf16.mxu0 %v2269_v18 }
 0x596   : > { %2004 = vmatmul.mubr.msk.bf16.vlgmr.msra.gmra.mrb[16].mxu0 %vm497_vm2, %v812_v45  ;;  %v1084_v45 = vsel %vm562_vm3, %v492_v44, 0 }
 0x597   : > { %2015 = vmatprep.mubr.msk.bf16.mxu0 %vm2270_vm1, %v2269_v18  ;;  %2014 = vmatpush3.bf16.msra.mxu0 %v926_v13  ;;  %v493_v13 = vld [vmem:[%s2668_s6 + $0x10] sm:$0xf] }
 0x598   : > { %2025 = vmatprep.subr.bf16.mxu0 %v2269_v18 }
 0x5ee   : > { %v805_v46 = vpop.f32.mrb[12].mxu1 }
 0x5ef   : > { %v1999_v48 = vpop.f32.mrb[13].mxu1 }
 0x5f0   : > { %v808_v49 = vpop.f32.mrb[14].mxu1 }
 0x5f1   : > { %v2000_v50 = vpop.f32.mrb[15].mxu1 }
 0x661   : > { %v759_v51 = vpop.f32.mrb[12].mxu0 }
 0x662   : > { %v2483_v52 = vadd.f32 %v805_v46, %v759_v51  ;;  %v1993_v54 = vpop.f32.mrb[13].mxu0 }
 0x663   : > { %v762_v55 = vpop.f32.mrb[14].mxu0 }
 0x664   : > { %v1994_v56 = vpop.f32.mrb[15].mxu0 }
 0x669   : > { %v855_v57 = vpop.f32.mrb[16].mxu0 }
 0x66a   : > { %v2005_v58 = vpop.f32.mrb[17].mxu0  ;;  %v861_v59 = vsel %vm497_vm2, %v855_v57, -inf }
 0x66b   : > { %862 = vmax.xlane.f32.xlu0 %v861_v59  ;;  %v858_v60 = vpop.f32.mrb[18].mxu0 }
 0x66c   : > { %v2006_v61 = vpop.f32.mrb[19].mxu0 }
 0x681   : > { %873 = vrot.lane.b32.xlu0 %v2426_v47, %s2275_s19  ;;  %s2282_s19 = smov 24  }
 0x685   : > { %969 = vrot.lane.b32.xlu0 %v2431_v53, %s2276_s20 }
 0x6f8   : > { %v863_v62 = vpop.xlane.xlu0 %862 }
 0x6f9   : > { %v864_v63 = vsub.f32 %v855_v57, %v863_v62 }
 0x6fb   : > { %v865_v0 = vmul.f32 1.442695, %v864_v63 }
 0x6fc   : > { %v874_v1 = vpop.permute.xlu0 %873 }
 0x6fd   : > { %2181 = vpow2.f32 %v865_v0  ;;  %v879_v2 = vsel %vm562_vm3, %v874_v1, 0 }
 0x6fe   : > { %2008 = vmatpush3.bf16.msra.mxu1 %v879_v2 }
 0x6ff   : > { %2019 = vmatprep.subr.bf16.mxu1 %v2269_v18 }
 0x700   : > { %v970_v11 = vpop.permute.xlu0 %969 }
 0x707   : > { %v2182_v3 = vpop.eup %2181 }
 0x708   : > { %v867_v4 = vsel %vm497_vm2, %v2182_v3, 0.0 }
 0x709   : > { %868 = vadd.xlane.f32.xlu1 %v867_v4 }
 0x71a   : > { %971 = vrot.lane.b32.xlu1 %v2426_v47, %s2276_s20  ;;  %s1892_s20 = sshll.u32 %s2353_s9, 7  ;;  %s1769_s9 = scalar_lea.sflag [#allocation3], %s307_s13 }
 0x71b   : > { %s2619_s25 = scalar_lea.hbm %s2670_s8, %s1892_s20 }
 0x796   : > { %v869_v5 = vpop.xlane.xlu1 %868 }
 0x797   : > { %2183 = vrcp.f32 %v869_v5 }
 0x79a   : > { %v972_v8 = vpop.permute.xlu1 %971 }
 0x79b   : > { %v977_v10 = vsel %vm497_vm2, %v972_v8, 0 }
 0x7a1   : > { %v2184_v6 = vpop.eup %2183 }
 0x7a2   : > { %v871_v7 = vmul.f32 %v2184_v6, %v2182_v3 }
 0x7a4   : > { %v872_v9 = vpack.c.bf16 %v871_v7, %v871_v7 }
 0x7a6   : > { %2010 = vmatmul.mubr.msk.bf16.vlgmr.msra.gmra.mrb[16].mxu1 %vm497_vm2, %v872_v9 }
 0x7a7   : > { %2020 = vmatpush3.bf16.xpose.msra.mxu1 %v977_v10  ;;  %2021 = vmatprep.mubr.msk.bf16.mxu1 %vm2270_vm1, %v2269_v18 }
 0x7a8   : > { %2031 = vmatprep.subr.bf16.mxu1 %v2269_v18 }
 0x7ae   : > { %2022 = vmatmul.mubr.msk.bf16.vlgmr.msra.gmra.mrb[20].mxu1 %vm497_vm2, %v970_v11 }
 0x7af   : > { %2033 = vmatprep.mubr.msk.bf16.mxu1 %vm2270_vm1, %v2269_v18  ;;  %2032 = vmatpush3.bf16.msra.mxu1 %v1084_v45  ;;  %v494_v45 = vld [vmem:[%s2668_s6 + $0x14] sm:$0xf] }
 0x7b0   : > { %2043 = vmatprep.subr.bf16.mxu1 %v2269_v18 }
 0x879   : > { %v915_v14 = vpop.f32.mrb[16].mxu1 }
 0x87a   : > { %v921_v15 = vpack.c.bf16 %v915_v14, %v915_v14  ;;  %v2011_v16 = vpop.f32.mrb[17].mxu1  ;;  %v1242_v14 = vsel %vm562_vm3, %v493_v13, 0  ;;  %v495_v13 = vld [vmem:[%s2668_s6 + $0x18] sm:$0xf] }
 0x87b   : > { %v918_v17 = vpop.f32.mrb[18].mxu1 }
 0x87c   : > { %v2012_v19 = vpop.f32.mrb[19].mxu1  ;;  %2016 = vmatmul.mubr.msk.bf16.vlgmr.msra.gmra.mrb[20].mxu0 %vm497_vm2, %v921_v15 }
 0x87d   : > { %2027 = vmatprep.mubr.msk.bf16.mxu0 %vm2270_vm1, %v2269_v18 }
 0x881   : > { %v1013_v20 = vpop.f32.mrb[20].mxu1 }
 0x882   : > { %v2023_v21 = vpop.f32.mrb[21].mxu1  ;;  %v1019_v22 = vsel %vm497_vm2, %v1013_v20, -inf }
 0x883   : > { %1020 = vmax.xlane.f32.xlu1 %v1019_v22  ;;  %v1016_v23 = vpop.f32.mrb[22].mxu1 }
 0x884   : > { %v2024_v24 = vpop.f32.mrb[23].mxu1 }
 0x894   : > { %1129 = vrot.lane.b32.xlu1 %v2426_v47, %s2277_s23 }
 0x898   : > { %1127 = vrot.lane.b32.xlu1 %v2431_v53, %s2277_s23  ;;  %s2284_s23 = smov 72  }
 0x910   : > { %v1021_v25 = vpop.xlane.xlu1 %1020 }
 0x911   : > { %v1022_v26 = vsub.f32 %v1013_v20, %v1021_v25 }
 0x913   : > { %v1023_v27 = vmul.f32 1.442695, %v1022_v26 }
 0x914   : > { %v1130_v40 = vpop.permute.xlu1 %1129 }
 0x915   : > { %2185 = vpow2.f32 %v1023_v27  ;;  %v1135_v42 = vsel %vm497_vm2, %v1130_v40, 0 }
 0x918   : > { %v1128_v43 = vpop.permute.xlu1 %1127 }
 0x91f   : > { %v2186_v28 = vpop.eup %2185 }
 0x920   : > { %v1025_v29 = vsel %vm497_vm2, %v2186_v28, 0.0 }
 0x921   : > { %1026 = vadd.xlane.f32.xlu0 %v1025_v29 }
 0x937   : > { %1031 = vrot.lane.b32.xlu0 %v2426_v47, %s2278_s24 }
 0x94f   : > { %v962_v30 = vpop.f32.mrb[20].mxu0 }
 0x950   : > { %v968_v31 = vadd.f32 %v962_v30, %v2483_v52  ;;  %v2017_v32 = vpop.f32.mrb[21].mxu0 }
 0x951   : > { %v965_v33 = vpop.f32.mrb[22].mxu0 }
 0x952   : > { %v2018_v34 = vpop.f32.mrb[23].mxu0 }
 0x9ae   : > { %v1027_v35 = vpop.xlane.xlu0 %1026 }
 0x9af   : > { %2187 = vrcp.f32 %v1027_v35 }
 0x9b2   : > { %v1032_v36 = vpop.permute.xlu0 %1031 }
 0x9b3   : > { %v1037_v37 = vsel %vm562_vm3, %v1032_v36, 0 }
 0x9b4   : > { %2026 = vmatpush3.bf16.msra.mxu0 %v1037_v37 }
 0x9b5   : > { %2037 = vmatprep.subr.bf16.mxu0 %v2269_v18 }
 0x9b9   : > { %v2188_v38 = vpop.eup %2187 }
 0x9ba   : > { %v1029_v39 = vmul.f32 %v2188_v38, %v2186_v28 }
 0x9bc   : > { %v1030_v41 = vpack.c.bf16 %v1029_v39, %v1029_v39 }
 0x9be   : > { %2028 = vmatmul.mubr.msk.bf16.vlgmr.msra.gmra.mrb[24].mxu0 %vm497_vm2, %v1030_v41 }
 0x9bf   : > { %2038 = vmatpush3.bf16.xpose.msra.mxu0 %v1135_v42  ;;  %2039 = vmatprep.mubr.msk.bf16.mxu0 %vm2270_vm1, %v2269_v18 }
 0x9c0   : > { %2049 = vmatprep.subr.bf16.mxu0 %v2269_v18 }
 0x9c6   : > { %2040 = vmatmul.mubr.msk.bf16.vlgmr.msra.gmra.mrb[28].mxu0 %vm497_vm2, %v1128_v43 }
 0x9c7   : > { %2051 = vmatprep.mubr.msk.bf16.mxu0 %vm2270_vm1, %v2269_v18  ;;  %2050 = vmatpush3.bf16.msra.mxu0 %v1242_v14  ;;  %v1558_v14 = vsel %vm562_vm3, %v495_v13, 0 }
 0x9c8   : > { %2061 = vmatprep.subr.bf16.mxu0 %v2269_v18 }
 0xa91   : > { %v1073_v46 = vpop.f32.mrb[24].mxu0 }
 0xa92   : > { %v1079_v48 = vpack.c.bf16 %v1073_v46, %v1073_v46  ;;  %v2029_v49 = vpop.f32.mrb[25].mxu0  ;;  %v1400_v46 = vsel %vm562_vm3, %v494_v45, 0 }
 0xa93   : > { %v1076_v50 = vpop.f32.mrb[26].mxu0 }
 0xa94   : > { %v2030_v51 = vpop.f32.mrb[27].mxu0  ;;  %2034 = vmatmul.mubr.msk.bf16.vlgmr.msra.gmra.mrb[24].mxu1 %vm497_vm2, %v1079_v48 }
 0xa95   : > { %2045 = vmatprep.mubr.msk.bf16.mxu1 %vm2270_vm1, %v2269_v18 }
 0xa99   : > { %v1171_v52 = vpop.f32.mrb[28].mxu0 }
 0xa9a   : > { %v2041_v54 = vpop.f32.mrb[29].mxu0  ;;  %v1177_v55 = vsel %vm497_vm2, %v1171_v52, -inf }
 0xa9b   : > { %1178 = vmax.xlane.f32.xlu0 %v1177_v55  ;;  %v1174_v56 = vpop.f32.mrb[30].mxu0 }
 0xa9c   : > { %v2042_v57 = vpop.f32.mrb[31].mxu0 }
 0xab1   : > { %1189 = vrot.lane.b32.xlu0 %v2426_v47, %s2279_s10  ;;  %s2286_s10 = smov [#allocation2]  }
 0xab5   : > { %1285 = vrot.lane.b32.xlu0 %v2431_v53, %s2280_s12 }
 0xb28   : > { %v1179_v58 = vpop.xlane.xlu0 %1178 }
 0xb29   : > { %v1180_v59 = vsub.f32 %v1171_v52, %v1179_v58 }
 0xb2b   : > { %v1181_v60 = vmul.f32 1.442695, %v1180_v59 }
 0xb2c   : > { %v1190_v61 = vpop.permute.xlu0 %1189 }
 0xb2d   : > { %2189 = vpow2.f32 %v1181_v60  ;;  %v1195_v62 = vsel %vm562_vm3, %v1190_v61, 0 }
 0xb2e   : > { %2044 = vmatpush3.bf16.msra.mxu1 %v1195_v62 }
 0xb2f   : > { %2055 = vmatprep.subr.bf16.mxu1 %v2269_v18 }
 0xb30   : > { %v1286_v12 = vpop.permute.xlu0 %1285 }
 0xb37   : > { %v2190_v63 = vpop.eup %2189 }
 0xb38   : > { %v1183_v0 = vsel %vm497_vm2, %v2190_v63, 0.0 }
 0xb39   : > { %1184 = vadd.xlane.f32.xlu1 %v1183_v0 }
 0xb4a   : > { %1287 = vrot.lane.b32.xlu1 %v2426_v47, %s2280_s12  ;;  %s2209_s12 = sshll.u32 %s2286_s10, 4  ;;  %s2210_s12 = int_to_ptr.vmem [resolvable:$false] %s2209_s12 }
 0xb4b   : > { %s2211_s17 = scalar_lea.vmem %s2210_s12, 256 }
 0xb67   : > { %v1120_v1 = vpop.f32.mrb[24].mxu1 }
 0xb68   : > { %v1126_v2 = vadd.f32 %v1120_v1, %v968_v31  ;;  %v2035_v3 = vpop.f32.mrb[25].mxu1 }
 0xb69   : > { %v1123_v4 = vpop.f32.mrb[26].mxu1 }
 0xb6a   : > { %v2036_v5 = vpop.f32.mrb[27].mxu1 }
 0xbc6   : > { %v1185_v6 = vpop.xlane.xlu1 %1184 }
 0xbc7   : > { %2191 = vrcp.f32 %v1185_v6 }
 0xbca   : > { %v1288_v9 = vpop.permute.xlu1 %1287 }
 0xbcb   : > { %v1293_v11 = vsel %vm497_vm2, %v1288_v9, 0 }
 0xbd1   : > { %v2192_v7 = vpop.eup %2191 }
 0xbd2   : > { %v1187_v8 = vmul.f32 %v2192_v7, %v2190_v63 }
 0xbd4   : > { %v1188_v10 = vpack.c.bf16 %v1187_v8, %v1187_v8 }
 0xbd6   : > { %2046 = vmatmul.mubr.msk.bf16.vlgmr.msra.gmra.mrb[28].mxu1 %vm497_vm2, %v1188_v10 }
 0xbd7   : > { %2056 = vmatpush3.bf16.xpose.msra.mxu1 %v1293_v11  ;;  %2057 = vmatprep.mubr.msk.bf16.mxu1 %vm2270_vm1, %v2269_v18 }
 0xbd8   : > { %2067 = vmatprep.subr.bf16.mxu1 %v2269_v18 }
 0xbde   : > { %2058 = vmatmul.mubr.msk.bf16.vlgmr.msra.gmra.mrb[32].mxu1 %vm497_vm2, %v1286_v12 }
 0xbdf   : > { %2069 = vmatprep.mubr.msk.bf16.mxu1 %vm2270_vm1, %v2269_v18  ;;  %2068 = vmatpush3.bf16.msra.mxu1 %v1400_v46 }
 0xbe0   : > { %2079 = vmatprep.subr.bf16.mxu1 %v2269_v18 }
 0xca9   : > { %v1231_v15 = vpop.f32.mrb[28].mxu1 }
 0xcaa   : > { %v1237_v16 = vpack.c.bf16 %v1231_v15, %v1231_v15  ;;  %v2047_v17 = vpop.f32.mrb[29].mxu1 }
 0xcab   : > { %v1234_v19 = vpop.f32.mrb[30].mxu1 }
 0xcac   : > { %v2048_v20 = vpop.f32.mrb[31].mxu1  ;;  %2052 = vmatmul.mubr.msk.bf16.vlgmr.msra.gmra.mrb[32].mxu0 %vm497_vm2, %v1237_v16 }
 0xcad   : > { %2063 = vmatprep.mubr.msk.bf16.mxu0 %vm2270_vm1, %v2269_v18 }
 0xcb1   : > { %v1329_v21 = vpop.f32.mrb[32].mxu1 }
 0xcb2   : > { %v2059_v22 = vpop.f32.mrb[33].mxu1  ;;  %v1335_v23 = vsel %vm497_vm2, %v1329_v21, -inf }
 0xcb3   : > { %1336 = vmax.xlane.f32.xlu1 %v1335_v23  ;;  %v1332_v24 = vpop.f32.mrb[34].mxu1 }
 0xcb4   : > { %v2060_v25 = vpop.f32.mrb[35].mxu1 }
 0xcc4   : > { %1445 = vrot.lane.b32.xlu1 %v2426_v47, %s2281_s18 }
 0xcc8   : > { %1443 = vrot.lane.b32.xlu1 %v2431_v53, %s2281_s18 }
 0xd40   : > { %v1337_v26 = vpop.xlane.xlu1 %1336 }
 0xd41   : > { %v1338_v27 = vsub.f32 %v1329_v21, %v1337_v26 }
 0xd43   : > { %v1339_v28 = vmul.f32 1.442695, %v1338_v27 }
 0xd44   : > { %v1446_v41 = vpop.permute.xlu1 %1445 }
 0xd45   : > { %2193 = vpow2.f32 %v1339_v28  ;;  %v1451_v43 = vsel %vm497_vm2, %v1446_v41, 0 }
 0xd48   : > { %v1444_v44 = vpop.permute.xlu1 %1443 }
 0xd4f   : > { %v2194_v29 = vpop.eup %2193 }
 0xd50   : > { %v1341_v30 = vsel %vm497_vm2, %v2194_v29, 0.0 }
 0xd51   : > { %1342 = vadd.xlane.f32.xlu0 %v1341_v30 }
 0xd67   : > { %1347 = vrot.lane.b32.xlu0 %v2426_v47, %s2282_s19 }
 0xd7f   : > { %v1278_v31 = vpop.f32.mrb[32].mxu0 }
 0xd80   : > { %v1284_v32 = vadd.f32 %v1278_v31, %v1126_v2  ;;  %v2053_v33 = vpop.f32.mrb[33].mxu0 }
 0xd81   : > { %v1281_v34 = vpop.f32.mrb[34].mxu0 }
 0xd82   : > { %v2054_v35 = vpop.f32.mrb[35].mxu0 }
 0xdde   : > { %v1343_v36 = vpop.xlane.xlu0 %1342 }
 0xddf   : > { %2195 = vrcp.f32 %v1343_v36 }
 0xde2   : > { %v1348_v37 = vpop.permute.xlu0 %1347 }
 0xde3   : > { %v1353_v38 = vsel %vm562_vm3, %v1348_v37, 0 }
 0xde4   : > { %2062 = vmatpush3.bf16.msra.mxu0 %v1353_v38 }
 0xde5   : > { %2073 = vmatprep.subr.bf16.mxu0 %v2269_v18 }
 0xde9   : > { %v2196_v39 = vpop.eup %2195 }
 0xdea   : > { %v1345_v40 = vmul.f32 %v2196_v39, %v2194_v29 }
 0xdec   : > { %v1346_v42 = vpack.c.bf16 %v1345_v40, %v1345_v40 }
 0xdee   : > { %2064 = vmatmul.mubr.msk.bf16.vlgmr.msra.gmra.mrb[36].mxu0 %vm497_vm2, %v1346_v42 }
 0xdef   : > { %2074 = vmatpush3.bf16.xpose.msra.mxu0 %v1451_v43  ;;  %2075 = vmatprep.mubr.msk.bf16.mxu0 %vm2270_vm1, %v2269_v18 }
 0xdf0   : > { %2085 = vmatprep.subr.bf16.mxu0 %v2269_v18 }
 0xdf6   : > { %2076 = vmatmul.mubr.msk.bf16.vlgmr.msra.gmra.mrb[40].mxu0 %vm497_vm2, %v1444_v44 }
 0xdf7   : > { %2087 = vmatprep.mubr.msk.bf16.mxu0 %vm2270_vm1, %v2269_v18  ;;  %2086 = vmatpush3.bf16.msra.mxu0 %v1558_v14 }
 0xdf8   : > { %2097 = vmatprep.subr.bf16.mxu0 %v2269_v18 }
 0xec1   : > { %v1389_v48 = vpop.f32.mrb[36].mxu0 }
 0xec2   : > { %v1395_v49 = vpack.c.bf16 %v1389_v48, %v1389_v48  ;;  %v2065_v50 = vpop.f32.mrb[37].mxu0 }
 0xec3   : > { %v1392_v51 = vpop.f32.mrb[38].mxu0 }
 0xec4   : > { %v2066_v52 = vpop.f32.mrb[39].mxu0  ;;  %2070 = vmatmul.mubr.msk.bf16.vlgmr.msra.gmra.mrb[36].mxu1 %vm497_vm2, %v1395_v49  ;;  %v1890_v49 = vld [vmem:[%s2669_s7] ss:$0 sm:$0xff] }
 0xec5   : > { %2081 = vmatprep.mubr.msk.bf16.mxu1 %vm2270_vm1, %v2269_v18 }
 0xec9   : > { %v1487_v54 = vpop.f32.mrb[40].mxu0 }
 0xeca   : > { %v2077_v55 = vpop.f32.mrb[41].mxu0  ;;  %v1493_v56 = vsel %vm497_vm2, %v1487_v54, -inf }
 0xecb   : > { %1494 = vmax.xlane.f32.xlu0 %v1493_v56  ;;  %v1490_v57 = vpop.f32.mrb[42].mxu0 }
 0xecc   : > { %v2078_v58 = vpop.f32.mrb[43].mxu0 }
 0xee1   : > { %1505 = vrot.lane.b32.xlu0 %v2426_v47, %s2283_s22  ;;  %s1782_s22 = sshll.u32 %s309_s21, 4  ;;  %s2621_s22 = int_to_ptr.vmem [resolvable:$true] %s1782_s22 }
 0xee2   : > { %p2212_p0 = scmp.lt.s32.totalorder %s2621_s22, %s2210_s12 }
 0xee5   : > { %1601 = vrot.lane.b32.xlu0 %v2431_v53, %s2284_s23 }
 0xf58   : > { %v1495_v59 = vpop.xlane.xlu0 %1494 }
 0xf59   : > { %v1496_v60 = vsub.f32 %v1487_v54, %v1495_v59 }
 0xf5b   : > { %v1497_v61 = vmul.f32 1.442695, %v1496_v60 }
 0xf5c   : > { %v1506_v62 = vpop.permute.xlu0 %1505 }
 0xf5d   : > { %2197 = vpow2.f32 %v1497_v61  ;;  %v1511_v63 = vsel %vm562_vm3, %v1506_v62, 0 }
 0xf5e   : > { %2080 = vmatpush3.bf16.msra.mxu1 %v1511_v63 }
 0xf5f   : > { %2091 = vmatprep.subr.bf16.mxu1 %v2269_v18 }
 0xf60   : > { %v1602_v12 = vpop.permute.xlu0 %1601 }
 0xf67   : > { %v2198_v0 = vpop.eup %2197 }
 0xf68   : > { %v1499_v1 = vsel %vm497_vm2, %v2198_v0, 0.0 }
 0xf69   : > { %1500 = vadd.xlane.f32.xlu1 %v1499_v1 }
 0xf7a   : > { %1603 = vrot.lane.b32.xlu1 %v2426_v47, %s2284_s23 }
 0xf97   : > { %v1436_v2 = vpop.f32.mrb[36].mxu1 }
 0xf98   : > { %v1442_v3 = vadd.f32 %v1436_v2, %v1284_v32  ;;  %v2071_v4 = vpop.f32.mrb[37].mxu1 }
 0xf99   : > { %v1439_v53 = vpop.f32.mrb[38].mxu1 }
 0xf9a   : > { %v2072_v5 = vpop.f32.mrb[39].mxu1 }
 0xff6   : > { %v1501_v6 = vpop.xlane.xlu1 %1500 }
 0xff7   : > { %2199 = vrcp.f32 %v1501_v6 }
 0xffa   : > { %v1604_v9 = vpop.permute.xlu1 %1603 }
 0xffb   : > { %v1609_v11 = vsel %vm497_vm2, %v1604_v9, 0 }
0x1001   : > { %v2200_v7 = vpop.eup %2199 }
0x1002   : > { %v1503_v8 = vmul.f32 %v2200_v7, %v2198_v0 }
0x1004   : > { %v1504_v10 = vpack.c.bf16 %v1503_v8, %v1503_v8 }
0x1006   : > { %2082 = vmatmul.mubr.msk.bf16.vlgmr.msra.gmra.mrb[40].mxu1 %vm497_vm2, %v1504_v10 }
0x1007   : > { %2092 = vmatpush3.bf16.xpose.msra.mxu1 %v1609_v11  ;;  %2093 = vmatprep.mubr.msk.bf16.mxu1 %vm2270_vm1, %v2269_v18 }
0x1008   : > { %2103 = vmatprep.subr.bf16.mxu1 %v2269_v18 }
0x100e   : > { %2094 = vmatmul.mubr.msk.bf16.vlgmr.msra.gmra.mrb[44].mxu1 %vm497_vm2, %v1602_v12 }
0x100f   : > { %2105 = vmatprep.mubr.msk.bf16.mxu1 %vm2270_vm1, %v2269_v18 }
0x10d9   : > { %v1547_v15 = vpop.f32.mrb[40].mxu1 }
0x10da   : > { %v1553_v16 = vpack.c.bf16 %v1547_v15, %v1547_v15  ;;  %v2083_v17 = vpop.f32.mrb[41].mxu1 }
0x10db   : > { %v1550_v19 = vpop.f32.mrb[42].mxu1 }
0x10dc   : > { %v2084_v20 = vpop.f32.mrb[43].mxu1  ;;  %2088 = vmatmul.mubr.msk.bf16.vlgmr.msra.gmra.mrb[44].mxu0 %vm497_vm2, %v1553_v16 }
0x10dd   : > { %2099 = vmatprep.mubr.msk.bf16.mxu0 %vm2270_vm1, %v2269_v18  ;;  %v496_v18 = vld [vmem:[%s2668_s6 + $0x1c] sm:$0xf] }
0x10de   : > { %v1716_v31 = vsel %vm562_vm3, %v496_v18, 0 }
0x10df   : > { %2104 = vmatpush3.bf16.msra.mxu1 %v1716_v31 }
0x10e1   : > { %v1645_v21 = vpop.f32.mrb[44].mxu1 }
0x10e2   : > { %v2095_v22 = vpop.f32.mrb[45].mxu1  ;;  %v1651_v23 = vsel %vm497_vm2, %v1645_v21, -inf }
0x10e3   : > { %1652 = vmax.xlane.f32.xlu1 %v1651_v23  ;;  %v1648_v24 = vpop.f32.mrb[46].mxu1 }
0x10e4   : > { %v2096_v25 = vpop.f32.mrb[47].mxu1 }
0x1170   : > { %v1653_v26 = vpop.xlane.xlu1 %1652 }
0x1171   : > { %v1654_v27 = vsub.f32 %v1645_v21, %v1653_v26 }
0x1173   : > { %v1655_v28 = vmul.f32 1.442695, %v1654_v27 }
0x1175   : > { %2201 = vpow2.f32 %v1655_v28 }
0x117f   : > { %v2202_v29 = vpop.eup %2201 }
0x1180   : > { %v1657_v30 = vsel %vm497_vm2, %v2202_v29, 0.0 }
0x1181   : > { %1658 = vadd.xlane.f32.xlu0 %v1657_v30 }
0x1197   : > { %1663 = vrot.lane.b32.xlu0 %v2426_v47, %s2285_s26  ;;  %s2205_s26 = scalar_lea.vmem %s2621_s22, 128 }
0x1198   : > { %p2206_p11 = scmp.ne.s32.totalorder %s2621_s22, %s2205_s26  ;;  %p2213_p1 = scmp.lt.s32.totalorder %s2211_s17, %s2205_s26 }
0x119a   : > { %p2207_p12 = pnand %p2206_p11, %p2370_p5  ;;  %p2214_p2 = por %p2213_p1, %p2212_p0 }
0x119c   : > { %p2208_p13 = pneg %p2207_p12 }
0x119e   : > { %p2215_p3 = pnand %p2214_p2, %p2208_p13 }
0x11af   : > { %v1594_v32 = vpop.f32.mrb[44].mxu0 }
0x11b0   : > { %v1600_v33 = vadd.f32 %v1594_v32, %v1442_v3  ;;  %v2089_v34 = vpop.f32.mrb[45].mxu0 }
0x11b1   : > { %v1597_v35 = vpop.f32.mrb[46].mxu0 }
0x11b2   : > { %v2090_v36 = vpop.f32.mrb[47].mxu0 }
0x120e   : > { %v1659_v37 = vpop.xlane.xlu0 %1658 }
0x120f   : > { %2203 = vrcp.f32 %v1659_v37 }
0x1212   : > { %v1664_v38 = vpop.permute.xlu0 %1663 }
0x1213   : > { %v1669_v39 = vsel %vm562_vm3, %v1664_v38, 0 }
0x1214   : > { %2098 = vmatpush3.bf16.msra.mxu0 %v1669_v39 }
0x1219   : > { %v2204_v47 = vpop.eup %2203 }
0x121a   : > { %v1661_v40 = vmul.f32 %v2204_v47, %v2202_v29 }
0x121c   : > { %v1662_v41 = vpack.c.bf16 %v1661_v40, %v1661_v40 }
0x121e   : > { %2100 = vmatmul.mubr.msk.bf16.vlgmr.msra.gmra.mrb[48].mxu0 %vm497_vm2, %v1662_v41 }
0x12f1   : > { %v1705_v42 = vpop.f32.mrb[48].mxu0 }
0x12f2   : > { %v1711_v43 = vpack.c.bf16 %v1705_v42, %v1705_v42  ;;  %v2101_v44 = vpop.f32.mrb[49].mxu0 }
0x12f3   : > { %v1708_v45 = vpop.f32.mrb[50].mxu0 }
0x12f4   : > { %v2102_v46 = vpop.f32.mrb[51].mxu0  ;;  %2106 = vmatmul.mubr.msk.bf16.vlgmr.msra.gmra.mrb[48].mxu1 %vm497_vm2, %v1711_v43 }
0x13c7   : > { %v1752_v48 = vpop.f32.mrb[48].mxu1 }
0x13c8   : > { %v1758_v50 = vadd.f32 %v1752_v48, %v1600_v33  ;;  %v2107_v51 = vpop.f32.mrb[49].mxu1 }
0x13c9   : > { %v1755_v52 = vpop.f32.mrb[50].mxu1 }
0x13ca   : > { %v1766_v54 = vadd.f32 %v1890_v49, %v1758_v50  ;;  %v2108_v55 = vpop.f32.mrb[51].mxu1 }
0x13cc   : > { %1767 = vst.msk [vmem:[%s309_s21] sm:$0xff] %vm327_vm0, %v1766_v54 }
0x13cd   : > { %2218 = shalt.err (!%p2215_p3)
}
0x13ce   : > { %s2219_s13 = scalar_lea.hbm %s2619_s25, 128  ;;  %s2223_s20 = scalar_lea.hbm %s2670_s8, 256 }
0x13cf   : > { %p2220_p4 = scmp.ne.s32.totalorder %s2619_s25, %s2219_s13  ;;  %p2224_p9 = scmp.lt.u32.totalorder %s2619_s25, %s2670_s8 }
0x13d0   : > { %p2225_p10 = scmp.lt.u32.totalorder %s2223_s20, %s2219_s13  ;;  %p2227_p12 = scmp.lt.u32.totalorder %s2219_s13, %s2619_s25 }
0x13d1   : > { %p2221_p7 = pnand %p2220_p4, %p2370_p5 }
0x13d2   : > { %p2226_p11 = por %p2225_p10, %p2224_p9 }
0x13d3   : > { %p2222_p8 = pneg %p2221_p7 }
0x13d4   : > { %p2228_p13 = por %p2227_p12, %p2226_p11 }
0x13d6   : > { %p2229_p0 = pnand %p2228_p13, %p2222_p8 }
0x13d8   : > { %2232 = shalt.err (!%p2229_p0)
}
0x13d9   : > { %2109 = dma.vmem_to_hbm [thread:$0]  (%p2370_p5), %s2621_s22, 128, %s2619_s25, %s1769_s9  }
0x13da PF: > { %p2115_p1 = scmp.ge.s32.totalorder %s2267_s30, 2  ;;  %s1794_s24 = sand.u32 1, %s2255_s27  }
0x13db   : > { %s1795_s26 = scalar_lea.sflag [#allocation3], %s1794_s24 }
0x13dc   : > { %p2112_p2 = pnand %p2115_p1, %p2374_p6 }
0x13de   : > { %2250 = dma.done.wait (!%p2112_p2), %s1795_s26, 128  }
0x13df   : > { %2252 = vsyncadd (!%p2112_p2), %s1795_s26, 4294967168  ;;  %p18_p3 = scmp.ge.s32.totalorder %s2357_s11, 4   ;;  %s2673_s27 = smov %s2259_s28 }
0x13e0   : > { %s2674_s28 = smov %s2263_s29  ;;  %s2675_s29 = smov %s2368_s14 }
0x13e1   : > { %s2676_s30 = smov %s2357_s11  ;;  %20 = sbr.rel (!%p18_p3) target bundleno = 3 (0x3), region = 90 }
0x13e8   :  { %1800 = vsyncpa [#allocation3], 1 }
0x13e9   :  { %1802 = vsyncpa [#allocation3 + $0x1], 1 }

</bundles_post_ra>
